<compile_context>
chip_gen: v6e
topology: v6e:2x2x1
jax: 0.10.0
libtpu: 0.0.40
codegen_flags: <defaults>
</compile_context>

<pallas_src>
import functools
import math

import jax
import jax.numpy as jnp
import numpy as np
from jax.experimental import pallas as pl
from jax.experimental.pallas import tpu as pltpu


# -----------------------------------------------------------------------------
# Host-side constants: flattened orthonormal 2-D DFT matrices (symmetric).
#   F2[(u*W+v), (h*W+w)] = exp(-2*pi*i*(u*h/H + v*w/W)) / sqrt(H*W)
# Returned in bf16: MXU operands (f32 accumulation in-kernel), halves the DMA.
# -----------------------------------------------------------------------------
def flattened_dft_mats(h, w, dtype=jnp.bfloat16):
    uh = np.outer(np.arange(h), np.arange(h)) / float(h)            # (H, H)
    vw = np.outer(np.arange(w), np.arange(w)) / float(w)            # (W, W)
    ang = -2.0 * np.pi * (uh[:, None, :, None] + vw[None, :, None, :])
    ang = ang.reshape(h * w, h * w)
    scale = 1.0 / math.sqrt(h * w)
    f2r = (np.cos(ang) * scale).astype(np.float32)
    f2i = (np.sin(ang) * scale).astype(np.float32)
    return jnp.asarray(f2r, dtype=dtype), jnp.asarray(f2i, dtype=dtype)


# -----------------------------------------------------------------------------
# Fused kernel: n_recurrent x (generator + DataConsistencyInKspace_I).
# Whole batch (stacked on M/sublanes) per grid step; state stays on-chip.
# -----------------------------------------------------------------------------
def _make_fused_kernel(n_recurrent):
    def kernel(tar_ref, refcat_ref, k0_ref, mask_ref,
               w1a_ref, w1ref_ref, b1_ref, w2_ref, b2_ref, jblk_ref,
               f2r_ref, f2i_ref,
               recon_ref, iter_ref):
        bf16 = jnp.bfloat16
        dot = lambda a, b: jnp.dot(a, b, preferred_element_type=jnp.float32)

        k0 = k0_ref[...]                       # (2nb, HW) f32
        mask = mask_ref[...]                   # (2nb, HW) f32
        inv_mask = 1.0 - mask                  # computed once, reused

        f2r = f2r_ref[...]                     # (HW, HW) bf16  cos / sqrt(HW)
        f2i = f2i_ref[...]                     # (HW, HW) bf16  sin / sqrt(HW)
        jblk = jblk_ref[...]                   # (2nb, 2nb) f32 block-diag "*i"

        w1a = w1a_ref[...].astype(bf16)        # (nb*hid, 2nb) block-diag W1 (tar cols)
        w2b = w2_ref[...].astype(bf16)         # (2nb, nb*hid) block-diag W2
        b2r = b2_ref[...]                      # (2nb, 1)

        # Loop-invariant generator contribution from (reflr, ref).
        c_hid = dot(w1ref_ref[...].astype(bf16),
                    refcat_ref[...].astype(bf16)) + b1_ref[...]     # (nb*hid, HW)

        I = tar_ref[...]                       # (2nb, HW) f32 current image state
        for it in range(n_recurrent):
            # ---- net_G_I stand-in: 1x1 conv -> ReLU -> 1x1 conv + residual --
            h = jnp.maximum(dot(w1a, I.astype(bf16)) + c_hid, 0.0)  # (nb*hid, HW)
            pred = dot(w2b, h.astype(bf16)) + b2r + I               # (2nb, HW)
            iter_ref[0, it, 0] = pred

            # ---- DataConsistencyInKspace_I (noise_lvl=None) ----------------
            # forward ortho 2-D FFT:  K = pred @ F2r + (Jblk @ pred) @ F2i
            jpred = dot(jblk, pred)                                 # exact 0/+-1 mix
            k = dot(pred.astype(bf16), f2r) + dot(jpred.astype(bf16), f2i)
            kd = inv_mask * k + mask * k0                           # DC blend (f32)
            iter_ref[0, it, 1] = kd

            # inverse ortho 2-D FFT (conjugate): X = kd @ F2r - (Jblk@kd) @ F2i
            jkd = dot(jblk, kd)
            I = dot(kd.astype(bf16), f2r) - dot(jkd.astype(bf16), f2i)

        recon_ref[...] = I

    return kernel


@functools.partial(jax.jit, static_argnames=("n_recurrent", "n_groups"))
def recurrent_model_forward(tag_image_sub, ref_image_sub, ref_image_full,
                            tag_kspace_full, tag_kspace_mask2d,
                            gen_params, f2r, f2i, n_recurrent, n_groups=1):
    n, c, hh, ww = tag_image_sub.shape
    hw = hh * ww
    assert n % n_groups == 0, "n_groups must divide the batch"
    nb = n // n_groups                 # batch elements per grid step
    rows = c * nb                      # matmul M rows per step (batch on M)

    w1, b1, w2, b2 = gen_params
    hid = w1.shape[1]

    # ---- HBM layout: stack (batch, channel) on sublanes, pixels on lanes ----
    tar = tag_image_sub.reshape(n * c, hw)
    k0 = tag_kspace_full.reshape(n * c, hw)
    mask = tag_kspace_mask2d.reshape(n * c, hw)
    refcat = jnp.concatenate([ref_image_sub, ref_image_full],
                             axis=1).reshape(n * 2 * c, hw)          # (4N, HW)

    # ---- block-diagonal (kron) generator weights: whole-batch matmuls ------
    w1t = jnp.transpose(w1)                                # (hid, 3c)
    w2t = jnp.transpose(w2)                                # (c, hid)
    eye = jnp.eye(nb, dtype=jnp.float32)
    w1a_blk = jnp.kron(eye, w1t[:, 0:c])                   # (nb*hid, c*nb)
    w1ref_blk = jnp.kron(eye, w1t[:, c:3 * c])             # (nb*hid, 2c*nb)
    b1_rows = jnp.tile(b1.reshape(hid, 1), (nb, 1))        # (nb*hid, 1)
    w2_blk = jnp.kron(eye, w2t)                            # (c*nb, nb*hid)
    b2_rows = jnp.tile(b2.reshape(c, 1), (nb, 1))          # (c*nb, 1)
    jsmall = jnp.asarray([[0.0, -1.0], [1.0, 0.0]], jnp.float32)
    jblk = jnp.kron(eye, jsmall)                           # (c*nb, c*nb)

    slab_spec = pl.BlockSpec((rows, hw), lambda g: (g, 0))
    refcat_spec = pl.BlockSpec((2 * rows, hw), lambda g: (g, 0))
    iter_spec = pl.BlockSpec((1, n_recurrent, 2, rows, hw),
                             lambda g: (g, 0, 0, 0, 0))

    def const_spec(shape):
        nd = len(shape)
        kwargs = {}
        if n_groups > 1:
            # loop-invariant constants: single-buffer when there are >1 steps
            kwargs["pipeline_mode"] = pl.Buffered(1)
        return pl.BlockSpec(shape, lambda g, _nd=nd: (0,) * _nd, **kwargs)

    recon_slab, iter_out = pl.pallas_call(
        _make_fused_kernel(n_recurrent),
        out_shape=(
            jax.ShapeDtypeStruct((n * c, hw), jnp.float32),
            jax.ShapeDtypeStruct((n_groups, n_recurrent, 2, rows, hw),
                                 jnp.float32),
        ),
        grid=(n_groups,),
        in_specs=[
            slab_spec, refcat_spec, slab_spec, slab_spec,
            const_spec(w1a_blk.shape), const_spec(w1ref_blk.shape),
            const_spec(b1_rows.shape), const_spec(w2_blk.shape),
            const_spec(b2_rows.shape), const_spec(jblk.shape),
            const_spec((hw, hw)), const_spec((hw, hw)),
        ],
        out_specs=(slab_spec, iter_spec),
        compiler_params=pltpu.CompilerParams(
            dimension_semantics=("parallel",)),
    )(tar, refcat, k0, mask,
      w1a_blk, w1ref_blk, b1_rows, w2_blk, b2_rows, jblk, f2r, f2i)

    # ---- unpack back to NCHW -----------------------------------------------
    recon = recon_slab.reshape(n, c, hh, ww)
    io = iter_out.reshape(n_groups, n_recurrent, 2, nb, c, hh, ww)
    io = jnp.transpose(io, (1, 2, 0, 3, 4, 5, 6)).reshape(
        n_recurrent, 2, n, c, hh, ww)
    net = {}
    for i in range(1, n_recurrent + 1):
        net['r%d_img_pred' % i] = io[i - 1, 0]
        net['r%d_kspc_img_dc' % i] = io[i - 1, 1]
    return recon, net


# -----------------------------------------------------------------------------
# Pure-JAX reference (jnp.fft, f32) for validation of the same forward pass.
# -----------------------------------------------------------------------------
def _forward_ref(tag_image_sub, ref_image_sub, ref_image_full,
                 tag_kspace_full, tag_kspace_mask2d, gen_params, n_recurrent):
    w1, b1, w2, b2 = gen_params
    I = tag_image_sub
    net = {}
    for i in range(1, n_recurrent + 1):
        x = jnp.concatenate([I, ref_image_sub, ref_image_full], axis=1)
        x = jnp.transpose(x, (0, 2, 3, 1))                        # (N, H, W, 6)
        h = jnp.maximum(x @ w1 + b1[0], 0.0)
        y = h @ w2 + b2[0] + jnp.transpose(I, (0, 2, 3, 1))
        pred = jnp.transpose(y, (0, 3, 1, 2))                     # (N, 2, H, W)
        net['r%d_img_pred' % i] = pred

        kc = jnp.fft.fft2(pred[:, 0] + 1j * pred[:, 1], norm="ortho")
        m0 = tag_kspace_mask2d[:, 0]
        m1 = tag_kspace_mask2d[:, 1]
        kr = (1.0 - m0) * kc.real + m0 * tag_kspace_full[:, 0]
        ki = (1.0 - m1) * kc.imag + m1 * tag_kspace_full[:, 1]
        net['r%d_kspc_img_dc' % i] = jnp.stack([kr, ki], axis=1)

        xc = jnp.fft.ifft2(kr + 1j * ki, norm="ortho")
        I = jnp.stack([xc.real, xc.imag], axis=1)
    return I, net


# -----------------------------------------------------------------------------
if __name__ == "__main__":
    N, C, H, W = 2, 2, 16, 16
    HIDDEN = 32
    N_RECURRENT = 3

    key = jax.random.PRNGKey(0)
    k1, k2, k3, k4, k5, k6, k7 = jax.random.split(key, 7)

    # inputs (real/imag images in [0, 1], as produced by the dataset pipeline)
    tag_image_sub = jax.random.uniform(k1, (N, C, H, W), jnp.float32)
    ref_image_sub = jax.random.uniform(k2, (N, C, H, W), jnp.float32)
    ref_image_full = jax.random.uniform(k3, (N, C, H, W), jnp.float32)
    tag_image_full = jax.random.uniform(k4, (N, C, H, W), jnp.float32)

    # fully-sampled k-space of the target image (ortho-normalized FFT), NCHW
    kfull = jnp.fft.fft2(tag_image_full[:, 0] + 1j * tag_image_full[:, 1],
                         norm="ortho")
    tag_kspace_full = jnp.stack([kfull.real, kfull.imag],
                                axis=1).astype(jnp.float32)

    # binary undersampling mask, duplicated over the (real, imag) channels
    mask2d = jax.random.bernoulli(k5, 0.3, (N, 1, H, W)).astype(jnp.float32)
    tag_kspace_mask2d = jnp.broadcast_to(mask2d, (N, C, H, W)).astype(jnp.float32)

    # deterministic generator parameters (gaussian_weights_init-style, std 0.02)
    w1 = 0.02 * jax.random.normal(k6, (3 * C, HIDDEN), jnp.float32)
    b1 = jnp.zeros((1, HIDDEN), jnp.float32)
    w2 = 0.02 * jax.random.normal(k7, (HIDDEN, C), jnp.float32)
    b2 = jnp.zeros((1, C), jnp.float32)
    gen_params = (w1, b1, w2, b2)

    # host-precomputed flattened 2-D DFT matrices (256x256 bf16 at 16x16)
    f2r, f2i = flattened_dft_mats(H, W)

    recon, net = recurrent_model_forward(
        tag_image_sub, ref_image_sub, ref_image_full,
        tag_kspace_full, tag_kspace_mask2d, gen_params, f2r, f2i,
        n_recurrent=N_RECURRENT)   # n_groups=1 (set 2 on v7x with larger batch)
    recon = jax.block_until_ready(recon)

    # validate against the pure-JAX (jnp.fft, f32) reference; bf16 MXU operands
    # require a loosened tolerance (the f32 variant matches at 1e-4).
    recon_ref, net_ref = _forward_ref(
        tag_image_sub, ref_image_sub, ref_image_full,
        tag_kspace_full, tag_kspace_mask2d, gen_params, N_RECURRENT)

    np.testing.assert_allclose(np.asarray(recon), np.asarray(recon_ref),
                               rtol=5e-2, atol=5e-2)
    for name in net_ref:
        np.testing.assert_allclose(np.asarray(net[name]),
                                   np.asarray(net_ref[name]),
                                   rtol=5e-2, atol=5e-2)

    print("KERNEL_OK")
</pallas_src>

<mosaic_0001>
module attributes {stable_mosaic.version = 11 : i64} {
  func.func @kernel(%arg0: i32, %arg1: memref<4x256xf32, #tpu.memory_space<vmem>>, %arg2: memref<8x256xf32, #tpu.memory_space<vmem>>, %arg3: memref<4x256xf32, #tpu.memory_space<vmem>>, %arg4: memref<4x256xf32, #tpu.memory_space<vmem>>, %arg5: memref<64x4xf32, #tpu.memory_space<vmem>>, %arg6: memref<64x8xf32, #tpu.memory_space<vmem>>, %arg7: memref<64x1xf32, #tpu.memory_space<vmem>>, %arg8: memref<4x64xf32, #tpu.memory_space<vmem>>, %arg9: memref<4x1xf32, #tpu.memory_space<vmem>>, %arg10: memref<4x4xf32, #tpu.memory_space<vmem>>, %arg11: memref<256x256xbf16, #tpu.memory_space<vmem>>, %arg12: memref<256x256xbf16, #tpu.memory_space<vmem>>, %arg13: memref<4x256xf32, #tpu.memory_space<vmem>>, %arg14: memref<1x3x2x4x256xf32, #tpu.memory_space<vmem>>) attributes {dimension_semantics = [#tpu.dimension_semantics<parallel>], iteration_bounds = array<i64: 1>, scalar_prefetch = 0 : i64, scratch_operands = 0 : i64, tpu.core_type = #tpu.core_type<tc>, window_params = [{transform_indices = @transform_0, window_bounds = array<i64: 4, 256>}, {transform_indices = @transform_1, window_bounds = array<i64: 8, 256>}, {transform_indices = @transform_2, window_bounds = array<i64: 4, 256>}, {transform_indices = @transform_3, window_bounds = array<i64: 4, 256>}, {pipeline_mode = #tpu.pipeline_mode<synchronous>, transform_indices = @transform_4, window_bounds = array<i64: 64, 4>}, {pipeline_mode = #tpu.pipeline_mode<synchronous>, transform_indices = @transform_5, window_bounds = array<i64: 64, 8>}, {pipeline_mode = #tpu.pipeline_mode<synchronous>, transform_indices = @transform_6, window_bounds = array<i64: 64, 1>}, {pipeline_mode = #tpu.pipeline_mode<synchronous>, transform_indices = @transform_7, window_bounds = array<i64: 4, 64>}, {pipeline_mode = #tpu.pipeline_mode<synchronous>, transform_indices = @transform_8, window_bounds = array<i64: 4, 1>}, {pipeline_mode = #tpu.pipeline_mode<synchronous>, transform_indices = @transform_9, window_bounds = array<i64: 4, 4>}, {pipeline_mode = #tpu.pipeline_mode<synchronous>, transform_indices = @transform_10, window_bounds = array<i64: 256, 256>}, {pipeline_mode = #tpu.pipeline_mode<synchronous>, transform_indices = @transform_11, window_bounds = array<i64: 256, 256>}, {transform_indices = @transform_12, window_bounds = array<i64: 4, 256>}, {transform_indices = @transform_13, window_bounds = array<i64: 1, 3, 2, 4, 256>}]} {
    %c0 = arith.constant 0 : index
    %c0_0 = arith.constant 0 : index
    %0 = vector.load %arg3[%c0, %c0_0] : memref<4x256xf32, #tpu.memory_space<vmem>>, vector<4x256xf32>
    %c0_1 = arith.constant 0 : index
    %c0_2 = arith.constant 0 : index
    %1 = vector.load %arg4[%c0_1, %c0_2] : memref<4x256xf32, #tpu.memory_space<vmem>>, vector<4x256xf32>
    %cst = arith.constant 1.000000e+00 : f32
    %2 = vector.broadcast %cst : f32 to vector<4x256xf32>
    %3 = arith.subf %2, %1 : vector<4x256xf32>
    %c0_3 = arith.constant 0 : index
    %c0_4 = arith.constant 0 : index
    %4 = vector.load %arg11[%c0_3, %c0_4] : memref<256x256xbf16, #tpu.memory_space<vmem>>, vector<256x256xbf16>
    %c0_5 = arith.constant 0 : index
    %c0_6 = arith.constant 0 : index
    %5 = vector.load %arg12[%c0_5, %c0_6] : memref<256x256xbf16, #tpu.memory_space<vmem>>, vector<256x256xbf16>
    %c0_7 = arith.constant 0 : index
    %c0_8 = arith.constant 0 : index
    %6 = vector.load %arg10[%c0_7, %c0_8] : memref<4x4xf32, #tpu.memory_space<vmem>>, vector<4x4xf32>
    %c0_9 = arith.constant 0 : index
    %c0_10 = arith.constant 0 : index
    %7 = vector.load %arg5[%c0_9, %c0_10] : memref<64x4xf32, #tpu.memory_space<vmem>>, vector<64x4xf32>
    %8 = arith.truncf %7 : vector<64x4xf32> to vector<64x4xbf16>
    %c0_11 = arith.constant 0 : index
    %c0_12 = arith.constant 0 : index
    %9 = vector.load %arg8[%c0_11, %c0_12] : memref<4x64xf32, #tpu.memory_space<vmem>>, vector<4x64xf32>
    %10 = arith.truncf %9 : vector<4x64xf32> to vector<4x64xbf16>
    %c0_13 = arith.constant 0 : index
    %c0_14 = arith.constant 0 : index
    %11 = vector.load %arg9[%c0_13, %c0_14] : memref<4x1xf32, #tpu.memory_space<vmem>>, vector<4x1xf32>
    %c0_15 = arith.constant 0 : index
    %c0_16 = arith.constant 0 : index
    %12 = vector.load %arg6[%c0_15, %c0_16] : memref<64x8xf32, #tpu.memory_space<vmem>>, vector<64x8xf32>
    %13 = arith.truncf %12 : vector<64x8xf32> to vector<64x8xbf16>
    %c0_17 = arith.constant 0 : index
    %c0_18 = arith.constant 0 : index
    %14 = vector.load %arg2[%c0_17, %c0_18] : memref<8x256xf32, #tpu.memory_space<vmem>>, vector<8x256xf32>
    %15 = arith.truncf %14 : vector<8x256xf32> to vector<8x256xbf16>
    %cst_19 = arith.constant dense<0.000000e+00> : vector<64x256xf32>
    %16 = tpu.matmul %13, %15, %cst_19 {dimension_numbers = #tpu.dot_dimension_numbers<[1], [0], [0], [1], [0, 0, 1, 1], [], []>} : vector<64x8xbf16>, vector<8x256xbf16>, vector<64x256xf32> -> vector<64x256xf32>
    %c0_20 = arith.constant 0 : index
    %c0_21 = arith.constant 0 : index
    %17 = vector.load %arg7[%c0_20, %c0_21] : memref<64x1xf32, #tpu.memory_space<vmem>>, vector<64x1xf32>
    %18 = vector.broadcast %17 : vector<64x1xf32> to vector<64x256xf32>
    %19 = arith.addf %16, %18 : vector<64x256xf32>
    %c0_22 = arith.constant 0 : index
    %c0_23 = arith.constant 0 : index
    %20 = vector.load %arg1[%c0_22, %c0_23] : memref<4x256xf32, #tpu.memory_space<vmem>>, vector<4x256xf32>
    %21 = arith.truncf %20 : vector<4x256xf32> to vector<4x256xbf16>
    %cst_24 = arith.constant dense<0.000000e+00> : vector<64x256xf32>
    %22 = tpu.matmul %8, %21, %cst_24 {dimension_numbers = #tpu.dot_dimension_numbers<[1], [0], [0], [1], [0, 0, 1, 1], [], []>} : vector<64x4xbf16>, vector<4x256xbf16>, vector<64x256xf32> -> vector<64x256xf32>
    %23 = arith.addf %22, %19 : vector<64x256xf32>
    %cst_25 = arith.constant 0.000000e+00 : f32
    %24 = vector.broadcast %cst_25 : f32 to vector<64x256xf32>
    %25 = arith.maximumf %23, %24 : vector<64x256xf32>
    %26 = arith.truncf %25 : vector<64x256xf32> to vector<64x256xbf16>
    %cst_26 = arith.constant dense<0.000000e+00> : vector<4x256xf32>
    %27 = tpu.matmul %10, %26, %cst_26 {dimension_numbers = #tpu.dot_dimension_numbers<[1], [0], [0], [1], [0, 0, 1, 1], [], []>} : vector<4x64xbf16>, vector<64x256xbf16>, vector<4x256xf32> -> vector<4x256xf32>
    %28 = vector.broadcast %11 : vector<4x1xf32> to vector<4x256xf32>
    %29 = arith.addf %27, %28 : vector<4x256xf32>
    %30 = arith.addf %29, %20 : vector<4x256xf32>
    %c0_27 = arith.constant 0 : index
    %c0_28 = arith.constant 0 : index
    %c0_29 = arith.constant 0 : index
    %c0_30 = arith.constant 0 : index
    %c0_31 = arith.constant 0 : index
    %31 = vector.load %arg14[%c0_27, %c0_28, %c0_29, %c0_30, %c0_31] : memref<1x3x2x4x256xf32, #tpu.memory_space<vmem>>, vector<1x1x1x4x256xf32>
    %32 = vector.shape_cast %31 : vector<1x1x1x4x256xf32> to vector<4x256xf32>
    %33 = vector.shape_cast %30 : vector<4x256xf32> to vector<1x1x1x4x256xf32>
    tpu.vector_store %arg14[%c0_27, %c0_28, %c0_29, %c0_30, %c0_31], %33 {strides = array<i32>} : memref<1x3x2x4x256xf32, #tpu.memory_space<vmem>>, vector<1x1x1x4x256xf32>,
    %cst_32 = arith.constant dense<0.000000e+00> : vector<4x256xf32>
    %34 = tpu.matmul %6, %30, %cst_32 {dimension_numbers = #tpu.dot_dimension_numbers<[1], [0], [0], [1], [0, 0, 1, 1], [], []>} : vector<4x4xf32>, vector<4x256xf32>, vector<4x256xf32> -> vector<4x256xf32>
    %35 = arith.truncf %30 : vector<4x256xf32> to vector<4x256xbf16>
    %cst_33 = arith.constant dense<0.000000e+00> : vector<4x256xf32>
    %36 = tpu.matmul %35, %4, %cst_33 {dimension_numbers = #tpu.dot_dimension_numbers<[1], [0], [0], [1], [0, 0, 1, 1], [], []>} : vector<4x256xbf16>, vector<256x256xbf16>, vector<4x256xf32> -> vector<4x256xf32>
    %37 = arith.truncf %34 : vector<4x256xf32> to vector<4x256xbf16>
    %cst_34 = arith.constant dense<0.000000e+00> : vector<4x256xf32>
    %38 = tpu.matmul %37, %5, %cst_34 {dimension_numbers = #tpu.dot_dimension_numbers<[1], [0], [0], [1], [0, 0, 1, 1], [], []>} : vector<4x256xbf16>, vector<256x256xbf16>, vector<4x256xf32> -> vector<4x256xf32>
    %39 = arith.addf %36, %38 : vector<4x256xf32>
    %40 = arith.mulf %3, %39 : vector<4x256xf32>
    %41 = arith.mulf %1, %0 : vector<4x256xf32>
    %42 = arith.addf %40, %41 : vector<4x256xf32>
    %c0_35 = arith.constant 0 : index
    %c0_36 = arith.constant 0 : index
    %c1 = arith.constant 1 : index
    %c0_37 = arith.constant 0 : index
    %c0_38 = arith.constant 0 : index
    %43 = vector.load %arg14[%c0_35, %c0_36, %c1, %c0_37, %c0_38] : memref<1x3x2x4x256xf32, #tpu.memory_space<vmem>>, vector<1x1x1x4x256xf32>
    %44 = vector.shape_cast %43 : vector<1x1x1x4x256xf32> to vector<4x256xf32>
    %45 = vector.shape_cast %42 : vector<4x256xf32> to vector<1x1x1x4x256xf32>
    tpu.vector_store %arg14[%c0_35, %c0_36, %c1, %c0_37, %c0_38], %45 {strides = array<i32>} : memref<1x3x2x4x256xf32, #tpu.memory_space<vmem>>, vector<1x1x1x4x256xf32>,
    %cst_39 = arith.constant dense<0.000000e+00> : vector<4x256xf32>
    %46 = tpu.matmul %6, %42, %cst_39 {dimension_numbers = #tpu.dot_dimension_numbers<[1], [0], [0], [1], [0, 0, 1, 1], [], []>} : vector<4x4xf32>, vector<4x256xf32>, vector<4x256xf32> -> vector<4x256xf32>
    %47 = arith.truncf %42 : vector<4x256xf32> to vector<4x256xbf16>
    %cst_40 = arith.constant dense<0.000000e+00> : vector<4x256xf32>
    %48 = tpu.matmul %47, %4, %cst_40 {dimension_numbers = #tpu.dot_dimension_numbers<[1], [0], [0], [1], [0, 0, 1, 1], [], []>} : vector<4x256xbf16>, vector<256x256xbf16>, vector<4x256xf32> -> vector<4x256xf32>
    %49 = arith.truncf %46 : vector<4x256xf32> to vector<4x256xbf16>
    %cst_41 = arith.constant dense<0.000000e+00> : vector<4x256xf32>
    %50 = tpu.matmul %49, %5, %cst_41 {dimension_numbers = #tpu.dot_dimension_numbers<[1], [0], [0], [1], [0, 0, 1, 1], [], []>} : vector<4x256xbf16>, vector<256x256xbf16>, vector<4x256xf32> -> vector<4x256xf32>
    %51 = arith.subf %48, %50 : vector<4x256xf32>
    %52 = arith.truncf %51 : vector<4x256xf32> to vector<4x256xbf16>
    %cst_42 = arith.constant dense<0.000000e+00> : vector<64x256xf32>
    %53 = tpu.matmul %8, %52, %cst_42 {dimension_numbers = #tpu.dot_dimension_numbers<[1], [0], [0], [1], [0, 0, 1, 1], [], []>} : vector<64x4xbf16>, vector<4x256xbf16>, vector<64x256xf32> -> vector<64x256xf32>
    %54 = arith.addf %53, %19 : vector<64x256xf32>
    %cst_43 = arith.constant 0.000000e+00 : f32
    %55 = vector.broadcast %cst_43 : f32 to vector<64x256xf32>
    %56 = arith.maximumf %54, %55 : vector<64x256xf32>
    %57 = arith.truncf %56 : vector<64x256xf32> to vector<64x256xbf16>
    %cst_44 = arith.constant dense<0.000000e+00> : vector<4x256xf32>
    %58 = tpu.matmul %10, %57, %cst_44 {dimension_numbers = #tpu.dot_dimension_numbers<[1], [0], [0], [1], [0, 0, 1, 1], [], []>} : vector<4x64xbf16>, vector<64x256xbf16>, vector<4x256xf32> -> vector<4x256xf32>
    %59 = vector.broadcast %11 : vector<4x1xf32> to vector<4x256xf32>
    %60 = arith.addf %58, %59 : vector<4x256xf32>
    %61 = arith.addf %60, %51 : vector<4x256xf32>
    %c0_45 = arith.constant 0 : index
    %c1_46 = arith.constant 1 : index
    %c0_47 = arith.constant 0 : index
    %c0_48 = arith.constant 0 : index
    %c0_49 = arith.constant 0 : index
    %62 = vector.load %arg14[%c0_45, %c1_46, %c0_47, %c0_48, %c0_49] : memref<1x3x2x4x256xf32, #tpu.memory_space<vmem>>, vector<1x1x1x4x256xf32>
    %63 = vector.shape_cast %62 : vector<1x1x1x4x256xf32> to vector<4x256xf32>
    %64 = vector.shape_cast %61 : vector<4x256xf32> to vector<1x1x1x4x256xf32>
    tpu.vector_store %arg14[%c0_45, %c1_46, %c0_47, %c0_48, %c0_49], %64 {strides = array<i32>} : memref<1x3x2x4x256xf32, #tpu.memory_space<vmem>>, vector<1x1x1x4x256xf32>,
    %cst_50 = arith.constant dense<0.000000e+00> : vector<4x256xf32>
    %65 = tpu.matmul %6, %61, %cst_50 {dimension_numbers = #tpu.dot_dimension_numbers<[1], [0], [0], [1], [0, 0, 1, 1], [], []>} : vector<4x4xf32>, vector<4x256xf32>, vector<4x256xf32> -> vector<4x256xf32>
    %66 = arith.truncf %61 : vector<4x256xf32> to vector<4x256xbf16>
    %cst_51 = arith.constant dense<0.000000e+00> : vector<4x256xf32>
    %67 = tpu.matmul %66, %4, %cst_51 {dimension_numbers = #tpu.dot_dimension_numbers<[1], [0], [0], [1], [0, 0, 1, 1], [], []>} : vector<4x256xbf16>, vector<256x256xbf16>, vector<4x256xf32> -> vector<4x256xf32>
    %68 = arith.truncf %65 : vector<4x256xf32> to vector<4x256xbf16>
    %cst_52 = arith.constant dense<0.000000e+00> : vector<4x256xf32>
    %69 = tpu.matmul %68, %5, %cst_52 {dimension_numbers = #tpu.dot_dimension_numbers<[1], [0], [0], [1], [0, 0, 1, 1], [], []>} : vector<4x256xbf16>, vector<256x256xbf16>, vector<4x256xf32> -> vector<4x256xf32>
    %70 = arith.addf %67, %69 : vector<4x256xf32>
    %71 = arith.mulf %3, %70 : vector<4x256xf32>
    %72 = arith.mulf %1, %0 : vector<4x256xf32>
    %73 = arith.addf %71, %72 : vector<4x256xf32>
    %c0_53 = arith.constant 0 : index
    %c1_54 = arith.constant 1 : index
    %c1_55 = arith.constant 1 : index
    %c0_56 = arith.constant 0 : index
    %c0_57 = arith.constant 0 : index
    %74 = vector.load %arg14[%c0_53, %c1_54, %c1_55, %c0_56, %c0_57] : memref<1x3x2x4x256xf32, #tpu.memory_space<vmem>>, vector<1x1x1x4x256xf32>
    %75 = vector.shape_cast %74 : vector<1x1x1x4x256xf32> to vector<4x256xf32>
    %76 = vector.shape_cast %73 : vector<4x256xf32> to vector<1x1x1x4x256xf32>
    tpu.vector_store %arg14[%c0_53, %c1_54, %c1_55, %c0_56, %c0_57], %76 {strides = array<i32>} : memref<1x3x2x4x256xf32, #tpu.memory_space<vmem>>, vector<1x1x1x4x256xf32>,
    %cst_58 = arith.constant dense<0.000000e+00> : vector<4x256xf32>
    %77 = tpu.matmul %6, %73, %cst_58 {dimension_numbers = #tpu.dot_dimension_numbers<[1], [0], [0], [1], [0, 0, 1, 1], [], []>} : vector<4x4xf32>, vector<4x256xf32>, vector<4x256xf32> -> vector<4x256xf32>
    %78 = arith.truncf %73 : vector<4x256xf32> to vector<4x256xbf16>
    %cst_59 = arith.constant dense<0.000000e+00> : vector<4x256xf32>
    %79 = tpu.matmul %78, %4, %cst_59 {dimension_numbers = #tpu.dot_dimension_numbers<[1], [0], [0], [1], [0, 0, 1, 1], [], []>} : vector<4x256xbf16>, vector<256x256xbf16>, vector<4x256xf32> -> vector<4x256xf32>
    %80 = arith.truncf %77 : vector<4x256xf32> to vector<4x256xbf16>
    %cst_60 = arith.constant dense<0.000000e+00> : vector<4x256xf32>
    %81 = tpu.matmul %80, %5, %cst_60 {dimension_numbers = #tpu.dot_dimension_numbers<[1], [0], [0], [1], [0, 0, 1, 1], [], []>} : vector<4x256xbf16>, vector<256x256xbf16>, vector<4x256xf32> -> vector<4x256xf32>
    %82 = arith.subf %79, %81 : vector<4x256xf32>
    %83 = arith.truncf %82 : vector<4x256xf32> to vector<4x256xbf16>
    %cst_61 = arith.constant dense<0.000000e+00> : vector<64x256xf32>
    %84 = tpu.matmul %8, %83, %cst_61 {dimension_numbers = #tpu.dot_dimension_numbers<[1], [0], [0], [1], [0, 0, 1, 1], [], []>} : vector<64x4xbf16>, vector<4x256xbf16>, vector<64x256xf32> -> vector<64x256xf32>
    %85 = arith.addf %84, %19 : vector<64x256xf32>
    %cst_62 = arith.constant 0.000000e+00 : f32
    %86 = vector.broadcast %cst_62 : f32 to vector<64x256xf32>
    %87 = arith.maximumf %85, %86 : vector<64x256xf32>
    %88 = arith.truncf %87 : vector<64x256xf32> to vector<64x256xbf16>
    %cst_63 = arith.constant dense<0.000000e+00> : vector<4x256xf32>
    %89 = tpu.matmul %10, %88, %cst_63 {dimension_numbers = #tpu.dot_dimension_numbers<[1], [0], [0], [1], [0, 0, 1, 1], [], []>} : vector<4x64xbf16>, vector<64x256xbf16>, vector<4x256xf32> -> vector<4x256xf32>
    %90 = vector.broadcast %11 : vector<4x1xf32> to vector<4x256xf32>
    %91 = arith.addf %89, %90 : vector<4x256xf32>
    %92 = arith.addf %91, %82 : vector<4x256xf32>
    %c0_64 = arith.constant 0 : index
    %c2 = arith.constant 2 : index
    %c0_65 = arith.constant 0 : index
    %c0_66 = arith.constant 0 : index
    %c0_67 = arith.constant 0 : index
    %93 = vector.load %arg14[%c0_64, %c2, %c0_65, %c0_66, %c0_67] : memref<1x3x2x4x256xf32, #tpu.memory_space<vmem>>, vector<1x1x1x4x256xf32>
    %94 = vector.shape_cast %93 : vector<1x1x1x4x256xf32> to vector<4x256xf32>
    %95 = vector.shape_cast %92 : vector<4x256xf32> to vector<1x1x1x4x256xf32>
    tpu.vector_store %arg14[%c0_64, %c2, %c0_65, %c0_66, %c0_67], %95 {strides = array<i32>} : memref<1x3x2x4x256xf32, #tpu.memory_space<vmem>>, vector<1x1x1x4x256xf32>,
    %cst_68 = arith.constant dense<0.000000e+00> : vector<4x256xf32>
    %96 = tpu.matmul %6, %92, %cst_68 {dimension_numbers = #tpu.dot_dimension_numbers<[1], [0], [0], [1], [0, 0, 1, 1], [], []>} : vector<4x4xf32>, vector<4x256xf32>, vector<4x256xf32> -> vector<4x256xf32>
    %97 = arith.truncf %92 : vector<4x256xf32> to vector<4x256xbf16>
    %cst_69 = arith.constant dense<0.000000e+00> : vector<4x256xf32>
    %98 = tpu.matmul %97, %4, %cst_69 {dimension_numbers = #tpu.dot_dimension_numbers<[1], [0], [0], [1], [0, 0, 1, 1], [], []>} : vector<4x256xbf16>, vector<256x256xbf16>, vector<4x256xf32> -> vector<4x256xf32>
    %99 = arith.truncf %96 : vector<4x256xf32> to vector<4x256xbf16>
    %cst_70 = arith.constant dense<0.000000e+00> : vector<4x256xf32>
    %100 = tpu.matmul %99, %5, %cst_70 {dimension_numbers = #tpu.dot_dimension_numbers<[1], [0], [0], [1], [0, 0, 1, 1], [], []>} : vector<4x256xbf16>, vector<256x256xbf16>, vector<4x256xf32> -> vector<4x256xf32>
    %101 = arith.addf %98, %100 : vector<4x256xf32>
    %102 = arith.mulf %3, %101 : vector<4x256xf32>
    %103 = arith.mulf %1, %0 : vector<4x256xf32>
    %104 = arith.addf %102, %103 : vector<4x256xf32>
    %c0_71 = arith.constant 0 : index
    %c2_72 = arith.constant 2 : index
    %c1_73 = arith.constant 1 : index
    %c0_74 = arith.constant 0 : index
    %c0_75 = arith.constant 0 : index
    %105 = vector.load %arg14[%c0_71, %c2_72, %c1_73, %c0_74, %c0_75] : memref<1x3x2x4x256xf32, #tpu.memory_space<vmem>>, vector<1x1x1x4x256xf32>
    %106 = vector.shape_cast %105 : vector<1x1x1x4x256xf32> to vector<4x256xf32>
    %107 = vector.shape_cast %104 : vector<4x256xf32> to vector<1x1x1x4x256xf32>
    tpu.vector_store %arg14[%c0_71, %c2_72, %c1_73, %c0_74, %c0_75], %107 {strides = array<i32>} : memref<1x3x2x4x256xf32, #tpu.memory_space<vmem>>, vector<1x1x1x4x256xf32>,
    %cst_76 = arith.constant dense<0.000000e+00> : vector<4x256xf32>
    %108 = tpu.matmul %6, %104, %cst_76 {dimension_numbers = #tpu.dot_dimension_numbers<[1], [0], [0], [1], [0, 0, 1, 1], [], []>} : vector<4x4xf32>, vector<4x256xf32>, vector<4x256xf32> -> vector<4x256xf32>
    %109 = arith.truncf %104 : vector<4x256xf32> to vector<4x256xbf16>
    %cst_77 = arith.constant dense<0.000000e+00> : vector<4x256xf32>
    %110 = tpu.matmul %109, %4, %cst_77 {dimension_numbers = #tpu.dot_dimension_numbers<[1], [0], [0], [1], [0, 0, 1, 1], [], []>} : vector<4x256xbf16>, vector<256x256xbf16>, vector<4x256xf32> -> vector<4x256xf32>
    %111 = arith.truncf %108 : vector<4x256xf32> to vector<4x256xbf16>
    %cst_78 = arith.constant dense<0.000000e+00> : vector<4x256xf32>
    %112 = tpu.matmul %111, %5, %cst_78 {dimension_numbers = #tpu.dot_dimension_numbers<[1], [0], [0], [1], [0, 0, 1, 1], [], []>} : vector<4x256xbf16>, vector<256x256xbf16>, vector<4x256xf32> -> vector<4x256xf32>
    %113 = arith.subf %110, %112 : vector<4x256xf32>
    %c0_79 = arith.constant 0 : index
    %c0_80 = arith.constant 0 : index
    %114 = vector.load %arg13[%c0_79, %c0_80] : memref<4x256xf32, #tpu.memory_space<vmem>>, vector<4x256xf32>
    tpu.vector_store %arg13[%c0_79, %c0_80], %113 {strides = array<i32>} : memref<4x256xf32, #tpu.memory_space<vmem>>, vector<4x256xf32>,
    return
  }
  func.func @transform_0(%arg0: i32) -> (i32, i32) {
    %c0_i32 = arith.constant 0 : i32
    %c0_i32_0 = arith.constant 0 : i32
    return %arg0, %c0_i32 : i32, i32
  }
  func.func @transform_1(%arg0: i32) -> (i32, i32) {
    %c0_i32 = arith.constant 0 : i32
    %c0_i32_0 = arith.constant 0 : i32
    return %arg0, %c0_i32 : i32, i32
  }
  func.func @transform_2(%arg0: i32) -> (i32, i32) {
    %c0_i32 = arith.constant 0 : i32
    %c0_i32_0 = arith.constant 0 : i32
    return %arg0, %c0_i32 : i32, i32
  }
  func.func @transform_3(%arg0: i32) -> (i32, i32) {
    %c0_i32 = arith.constant 0 : i32
    %c0_i32_0 = arith.constant 0 : i32
    return %arg0, %c0_i32 : i32, i32
  }
  func.func @transform_4(%arg0: i32) -> (i32, i32) {
    %c0_i32 = arith.constant 0 : i32
    %c0_i32_0 = arith.constant 0 : i32
    %c0_i32_1 = arith.constant 0 : i32
    return %c0_i32, %c0_i32_0 : i32, i32
  }
  func.func @transform_5(%arg0: i32) -> (i32, i32) {
    %c0_i32 = arith.constant 0 : i32
    %c0_i32_0 = arith.constant 0 : i32
    %c0_i32_1 = arith.constant 0 : i32
    return %c0_i32, %c0_i32_0 : i32, i32
  }
  func.func @transform_6(%arg0: i32) -> (i32, i32) {
    %c0_i32 = arith.constant 0 : i32
    %c0_i32_0 = arith.constant 0 : i32
    %c0_i32_1 = arith.constant 0 : i32
    return %c0_i32, %c0_i32_0 : i32, i32
  }
  func.func @transform_7(%arg0: i32) -> (i32, i32) {
    %c0_i32 = arith.constant 0 : i32
    %c0_i32_0 = arith.constant 0 : i32
    %c0_i32_1 = arith.constant 0 : i32
    return %c0_i32, %c0_i32_0 : i32, i32
  }
  func.func @transform_8(%arg0: i32) -> (i32, i32) {
    %c0_i32 = arith.constant 0 : i32
    %c0_i32_0 = arith.constant 0 : i32
    %c0_i32_1 = arith.constant 0 : i32
    return %c0_i32, %c0_i32_0 : i32, i32
  }
  func.func @transform_9(%arg0: i32) -> (i32, i32) {
    %c0_i32 = arith.constant 0 : i32
    %c0_i32_0 = arith.constant 0 : i32
    %c0_i32_1 = arith.constant 0 : i32
    return %c0_i32, %c0_i32_0 : i32, i32
  }
  func.func @transform_10(%arg0: i32) -> (i32, i32) {
    %c0_i32 = arith.constant 0 : i32
    %c0_i32_0 = arith.constant 0 : i32
    %c0_i32_1 = arith.constant 0 : i32
    return %c0_i32, %c0_i32_0 : i32, i32
  }
  func.func @transform_11(%arg0: i32) -> (i32, i32) {
    %c0_i32 = arith.constant 0 : i32
    %c0_i32_0 = arith.constant 0 : i32
    %c0_i32_1 = arith.constant 0 : i32
    return %c0_i32, %c0_i32_0 : i32, i32
  }
  func.func @transform_12(%arg0: i32) -> (i32, i32) {
    %c0_i32 = arith.constant 0 : i32
    %c0_i32_0 = arith.constant 0 : i32
    return %arg0, %c0_i32 : i32, i32
  }
  func.func @transform_13(%arg0: i32) -> (i32, i32, i32, i32, i32) {
    %c0_i32 = arith.constant 0 : i32
    %c0_i32_0 = arith.constant 0 : i32
    %c0_i32_1 = arith.constant 0 : i32
    %c0_i32_2 = arith.constant 0 : i32
    %c0_i32_3 = arith.constant 0 : i32
    return %arg0, %c0_i32, %c0_i32_0, %c0_i32_1, %c0_i32_2 : i32, i32, i32, i32, i32
  }
}

</mosaic_0001>

<bundles_post_ra>
// kernel: recurrent_model_forward.1
= control target key start
LH: loop header
LB: loop body
LE: loop exit
PB: predicated region body
PF: predicated region fallthrough
CT: control target
= control target key end

     0   :  { %vm204_vm0 = vcmask 1043456   ;;  %vm303_vm1 = vcmask 1041408   ;;  %v3887_v3 = vmov 0   ;;  %vm191_vm2 = vcmask 64512   ;;  %s3873_s1 = inlined_call_operand.vmem [shape: f32[8,256], index: 1, kind: input, shape index: {}]   ;;  %s3874_s0 = inlined_call_operand.vmem [shape: f32[4,256], index: 0, kind: input, shape index: {}]   ;;  %s3875_s5 = inlined_call_operand.vmem [shape: f32[64,8], index: 5, kind: input, shape index: {}]   ;;  %s3876_s4 = inlined_call_operand.vmem [shape: f32[64,4], index: 4, kind: input, shape index: {}]   ;;  %s3877_s6 = inlined_call_operand.vmem [shape: f32[64,1], index: 6, kind: input, shape index: {}]   ;;  %s3878_s8 = inlined_call_operand.vmem [shape: f32[4,1], index: 8, kind: input, shape index: {}]   ;;  %s3879_s7 = inlined_call_operand.vmem [shape: f32[4,64], index: 7, kind: input, shape index: {}]   ;;  %s3880_s10 = inlined_call_operand.vmem [shape: bf16[256,256], index: 10, kind: input, shape index: {}]   ;;  %s3881_s11 = inlined_call_operand.vmem [shape: bf16[256,256], index: 11, kind: input, shape index: {}]   ;;  %s3882_s9 = inlined_call_operand.vmem [shape: f32[4,4], index: 9, kind: input, shape index: {}]   ;;  %s3883_s13 = inlined_call_operand.vmem [shape: f32[1,3,2,4,256], index: 13, kind: output, shape index: {1}]   ;;  %s3884_s3 = inlined_call_operand.vmem [shape: f32[4,256], index: 3, kind: input, shape index: {}]   ;;  %s3885_s2 = inlined_call_operand.vmem [shape: f32[4,256], index: 2, kind: input, shape index: {}]   ;;  %s3886_s12 = inlined_call_operand.vmem [shape: f32[4,256], index: 12, kind: output, shape index: {0}]  }
   0x1   :  { %v140_v0 = vld [vmem:[%s3873_s1 + $0x8] sm:$0xff]  ;;  %v139_v1 = vld [vmem:[%s3873_s1] sm:$0xff]  ;;  %243 = vmatprep.mubr.bf16.mxu0 %v3887_v3  ;;  %342 = vmatprep.mubr.bf16.mxu1 %v3887_v3  ;;  %vm290_vm3 = vcmask 31744   ;;  %v149_v17 = vld [vmem:[%s3877_s6 + $0x30] sm:$0xff]  ;;  %vm412_vm4 = vcmask 523264  }
   0x2   :  { %v2471_v2 = vld [vmem:[%s3874_s0] sm:$0xff]  ;;  %v142_v4 = vpack.c.bf16 %v140_v0, %v140_v0  ;;  %v141_v5 = vpack.c.bf16 %v139_v1, %v139_v1  ;;  %v128_v9 = vld [vmem:[%s3875_s5 + $0x8] sm:$0xff]  ;;  %2226 = vset.pattern.permute.xlu0 %v3887_v3  ;;  %2227 = vset.pattern.permute.xlu1 %v3887_v3  ;;  %v129_v19 = vld [vmem:[%s3875_s5 + $0x10] sm:$0xff] }
   0x3   :  { %v2477_v6 = vcombine.high %v2471_v2, %v2471_v2  ;;  %v288_v7 = vpack.c.bf16 %v2471_v2, %v2471_v2  ;;  %v127_v8 = vld [vmem:[%s3875_s5] sm:$0xff]  ;;  %v113_v11 = vld [vmem:[%s3876_s4 + $0x8] sm:$0xff]  ;;  %183 = vperm.xlu0 %2226, %v149_v17   ;;  %v130_v20 = vld [vmem:[%s3875_s5 + $0x18] sm:$0xff] }
   0x4   :  { %v112_v10 = vld [vmem:[%s3876_s4] sm:$0xff]  ;;  %2114 = vmatprep.subr.msk.bf16.mxu0 %vm204_vm0, %v142_v4  ;;  %v206_v12 = vsel %vm204_vm0, %v141_v5, 0  ;;  %v135_v15 = vpack.c.bf16 %v128_v9, %v127_v8  ;;  %v150_v21 = vld [vmem:[%s3877_s6 + $0x38] sm:$0xff]  ;;  %v148_v22 = vld [vmem:[%s3877_s6 + $0x28] sm:$0xff]  ;;  %v136_v25 = vpack.c.bf16 %v130_v20, %v129_v19 }
   0x5   :  { %v289_v13 = vpack.c.bf16 %v2477_v6, %v2477_v6  ;;  %v305_v14 = vsel %vm303_vm1, %v288_v7, 0  ;;  %226 = vmatpush1.bf16.msra.mxu0 %v206_v12  ;;  %v2501_v16 = vpack.c.bf16 %v113_v11, %v112_v10  ;;  %v147_v18 = vld [vmem:[%s3877_s6 + $0x20] sm:$0xff]  ;;  %v114_v23 = vld [vmem:[%s3876_s4 + $0x10] sm:$0xff]  ;;  %v115_v24 = vld [vmem:[%s3876_s4 + $0x18] sm:$0xff] }
   0x6   :  { %173 = vperm.xlu1 %2227, %v147_v18   ;;  %v145_v26 = vld [vmem:[%s3877_s6 + $0x10] sm:$0xff]  ;;  %v2535_v27 = vpack.c.bf16 %v115_v24, %v114_v23  ;;  %v146_v28 = vld [vmem:[%s3877_s6 + $0x18] sm:$0xff]  ;;  %v131_v29 = vld [vmem:[%s3875_s5 + $0x20] sm:$0xff] }
   0x7   :  { %2119 = vmatprep.subr.msk.bf16.mxu1 %vm303_vm1, %v289_v13  ;;  %4017 = vst [vmem:[#allocation2_spill] sm:$0xff] %v2501_v16  ;;  %188 = vperm.xlu0 %2226, %v150_v21   ;;  %v132_v30 = vld [vmem:[%s3875_s5 + $0x28] sm:$0xff]  ;;  %v143_v31 = vld [vmem:[%s3877_s6] sm:$0xff]  ;;  %v133_v38 = vld [vmem:[%s3875_s5 + $0x30] sm:$0xff] }
   0x8   :  { %325 = vmatpush1.bf16.msra.mxu1 %v305_v14  ;;  %2115 = vmatmul.mubr.msk.bf16.vlgmr.msra.gmra.mxu0 %vm191_vm2, %v135_v15  ;;  %4018 = vst [vmem:[#allocation3_spill] sm:$0xff] %v2535_v27  ;;  %v144_v32 = vld [vmem:[%s3877_s6 + $0x8] sm:$0xff]  ;;  %v116_v33 = vld [vmem:[%s3876_s4 + $0x20] sm:$0xff]  ;;  %v137_v35 = vpack.c.bf16 %v132_v30, %v131_v29  ;;  %v134_v39 = vld [vmem:[%s3875_s5 + $0x38] sm:$0xff] }
   0x9   :  { %253 = vmatprep.mubr.bf16.mxu0 %v3887_v3  ;;  %v117_v34 = vld [vmem:[%s3876_s4 + $0x28] sm:$0xff]  ;;  %v126_v36 = vld [vmem:[%s3878_s8] sm:$0xf]  ;;  %v118_v40 = vld [vmem:[%s3876_s4 + $0x30] sm:$0xff]  ;;  %v138_v42 = vpack.c.bf16 %v134_v39, %v133_v38 }
   0xa   :  { %178 = vperm.xlu1 %2227, %v148_v22   ;;  %v2566_v37 = vpack.c.bf16 %v117_v34, %v116_v33  ;;  %v119_v41 = vld [vmem:[%s3876_s4 + $0x38] sm:$0xff] }
   0xb   :  { %2120 = vmatmul.mubr.msk.bf16.vlgmr.msra.gmra.mxu1 %vm290_vm3, %v2501_v16  ;;  %163 = vperm.xlu0 %2226, %v145_v26   ;;  %v2585_v43 = vpack.c.bf16 %v119_v41, %v118_v40  ;;  %v3061_v16 = vld [vmem:[%s3880_s10 + $0x80] ss:$8 sps:$4 sm:$0xff]  }
   0xc   :  { %352 = vmatprep.mubr.bf16.mxu1 %v3887_v3  ;;  %4019 = vst [vmem:[#allocation4_spill] sm:$0xff] %v2566_v37  ;;  %4074 = vst [vmem:[#allocation59_spill] sm:$0xff] %v3061_v16 }
   0xd   :  { %4020 = vst [vmem:[#allocation5_spill] sm:$0xff] %v2585_v43 }
   0xe   :  { %168 = vperm.xlu1 %2227, %v146_v28  }
   0xf   :  { %153 = vperm.xlu0 %2226, %v143_v31  }
  0x10   :  { %2116 = vmatmul.mubr.msk.bf16.gmra.mxu0 %vm191_vm2, %v136_v25 }
  0x11   :  { %263 = vmatprep.mubr.bf16.mxu0 %v3887_v3 }
  0x12   :  { %158 = vperm.xlu1 %2227, %v144_v32  }
  0x13   :  { %2121 = vmatmul.mubr.msk.bf16.gmra.mxu1 %vm290_vm3, %v2535_v27  ;;  %409 = vperm.xlu0 %2226, %v126_v36   ;;  %v3055_v27 = vld [vmem:[%s3880_s10 + $0x84] ss:$8 sps:$4 sm:$0xff]  }
  0x14   :  { %362 = vmatprep.mubr.bf16.mxu1 %v3887_v3  ;;  %4073 = vst [vmem:[#allocation58_spill] sm:$0xff] %v3055_v27 }
  0x18   :  { %2117 = vmatmul.mubr.msk.bf16.gmra.mxu0 %vm191_vm2, %v137_v35 }
  0x19   :  { %273 = vmatprep.mubr.bf16.mxu0 %v3887_v3 }
  0x1b   :  { %2122 = vmatmul.mubr.msk.bf16.gmra.mxu1 %vm290_vm3, %v2566_v37  ;;  %v3049_v37 = vld [vmem:[%s3880_s10 + $0x90] ss:$8 sps:$4 sm:$0xff]  }
  0x1c   :  { %372 = vmatprep.mubr.bf16.mxu1 %v3887_v3  ;;  %4072 = vst [vmem:[#allocation57_spill] sm:$0xff] %v3049_v37 }
  0x20   :  { %2118 = vmatmul.mubr.msk.bf16.gmra.mxu0 %vm191_vm2, %v138_v42 }
  0x23   :  { %2123 = vmatmul.mubr.msk.bf16.gmra.mxu1 %vm290_vm3, %v2585_v43  ;;  %v3043_v43 = vld [vmem:[%s3880_s10 + $0x94] ss:$8 sps:$4 sm:$0xff]  }
  0x24   :  { %448 = vmatprep.mubr.bf16.mxu1 %v3887_v3  ;;  %4071 = vst [vmem:[#allocation56_spill] sm:$0xff] %v3043_v43 }
  0x7e   :  { %v184_v62 = vpop.permute.xlu0 %183 }
  0x81   :  { %v174_v59 = vpop.permute.xlu1 %173 }
  0x82   :  { %v189_v9 = vpop.permute.xlu0 %188 }
  0x85   :  { %v179_v5 = vpop.permute.xlu1 %178 }
  0x86   :  { %v164_v21 = vpop.permute.xlu0 %163 }
  0x89   :  { %v169_v14 = vpop.permute.xlu1 %168 }
  0x8d   :  { %v159_v36 = vpop.permute.xlu1 %158 }
  0xc8   :  { %v2591_v44 = vpop.f32.mrf.mxu0 }
  0xca   :  { %v2593_v45 = vpop.f32.mrf.mxu0 }
  0xcb   :  { %v2595_v46 = vpop.f32.mrf.mxu1 }
  0xcc   :  { %v2597_v47 = vpop.f32.mrf.mxu0 }
  0xcd   :  { %v2599_v48 = vpop.f32.mrf.mxu1 }
  0xce   :  { %v251_v49 = vpop.f32.mrf.mxu0 }
  0xcf   :  { %v2601_v50 = vpop.f32.mrf.mxu1  ;;  %v2633_v41 = vadd.f32 %v251_v49, %v159_v36 }
  0xd0   :  { %v255_v51 = vpop.f32.mrf.mxu0 }
  0xd1   :  { %v2603_v52 = vpop.f32.mrf.mxu1  ;;  %4031 = vst [vmem:[#allocation16_spill] sm:$0xff] %v2633_v41 }
  0xd2   :  { %v257_v53 = vpop.f32.mrf.mxu0 }
  0xd3   :  { %v2605_v54 = vpop.f32.mrf.mxu1  ;;  %v2629_v38 = vadd.f32 %v257_v53, %v164_v21 }
  0xd4   :  { %v259_v55 = vpop.f32.mrf.mxu0 }
  0xd5   :  { %v356_v56 = vpop.f32.mrf.mxu1  ;;  %4030 = vst [vmem:[#allocation15_spill] sm:$0xff] %v2629_v38  ;;  %v2635_v42 = vadd.f32 %v259_v55, %v169_v14 }
  0xd6   :  { %v261_v57 = vpop.f32.mrf.mxu0  ;;  %v357_v49 = vadd.f32 %v356_v56, %v2629_v38  ;;  %v2983_v38 = vld [vmem:[%s3880_s10 + $0xe4] ss:$8 sps:$4 sm:$0xff]  }
  0xd7   :  { %v358_v58 = vpop.f32.mrf.mxu1  ;;  %v2617_v24 = vadd.f32 %v261_v57, %v169_v14  ;;  %4032 = vst [vmem:[#allocation17_spill] sm:$0xff] %v2635_v42  ;;  %4061 = vst [vmem:[#allocation46_spill] sm:$0xff] %v2983_v38 }
  0xd8   :  { %v265_v60 = vpop.f32.mrf.mxu0 }
  0xd9   :  { %v360_v61 = vpop.f32.mrf.mxu1  ;;  %4026 = vst [vmem:[#allocation11_spill] sm:$0xff] %v2617_v24  ;;  %v2626_v33 = vadd.f32 %v265_v60, %v174_v59 }
  0xda   :  { %v267_v63 = vpop.f32.mrf.mxu0 }
  0xdb   :  { %v364_v0 = vpop.f32.mrf.mxu1  ;;  %v2613_v22 = vadd.f32 %v267_v63, %v174_v59  ;;  %4029 = vst [vmem:[#allocation14_spill] sm:$0xff] %v2626_v33  ;;  %v361_v59 = vadd.f32 %v360_v61, %v2617_v24  ;;  %v359_v61 = vadd.f32 %v358_v58, %v2635_v42  ;;  %v388_v58 = vmax.f32 %v357_v49, 0.0  ;;  %v2745_v49 = vld [vmem:[%s3881_s11 + $0x14] ss:$8 sps:$4 sm:$0xff]   ;;  %v2977_v42 = vld [vmem:[%s3880_s10 + $0xf0] ss:$8 sps:$4 sm:$0xff]  }
  0xdc   :  { %v269_v1 = vpop.f32.mrf.mxu0  ;;  %v365_v53 = vadd.f32 %v364_v0, %v2626_v33  ;;  %4039 = vst [vmem:[#allocation24_spill] sm:$0xff] %v2745_v49  ;;  %4060 = vst [vmem:[#allocation45_spill] sm:$0xff] %v2977_v42  ;;  %v2989_v33 = vld [vmem:[%s3880_s10 + $0xe0] ss:$8 sps:$4 sm:$0xff]   ;;  %v2995_v24 = vld [vmem:[%s3880_s10 + $0xd4] ss:$8 sps:$4 sm:$0xff]  }
  0xdd   :  { %v366_v4 = vpop.f32.mrf.mxu1  ;;  %4024 = vst [vmem:[#allocation9_spill] sm:$0xff] %v2613_v22  ;;  %v2619_v25 = vadd.f32 %v269_v1, %v179_v5  ;;  %4062 = vst [vmem:[#allocation47_spill] sm:$0xff] %v2989_v33 }
  0xde   :  { %v271_v7 = vpop.f32.mrf.mxu0  ;;  %v367_v39 = vadd.f32 %v366_v4, %v2613_v22  ;;  %v391_v14 = vmax.f32 %v365_v53, 0.0  ;;  %v2733_v53 = vld [vmem:[%s3881_s11 + $0x24] ss:$8 sps:$4 sm:$0xff]   ;;  %4063 = vst [vmem:[#allocation48_spill] sm:$0xff] %v2995_v24  ;;  %v3013_v22 = vld [vmem:[%s3880_s10 + $0xc0] ss:$8 sps:$4 sm:$0xff]  }
  0xdf   :  { %v368_v8 = vpop.f32.mrf.mxu1  ;;  %v2607_v15 = vadd.f32 %v271_v7, %v179_v5  ;;  %4027 = vst [vmem:[#allocation12_spill] sm:$0xff] %v2619_v25  ;;  %v154_v5 = vpop.permute.xlu0 %153  ;;  %v2639_v7 = vadd.f32 %v255_v51, %v164_v21  ;;  %v351_v51 = vadd.f32 %v2603_v52, %v2633_v41  ;;  %v389_v52 = vmax.f32 %v359_v61, 0.0  ;;  %v2763_v61 = vld [vmem:[%s3881_s11] ss:$8 sps:$4 sm:$0xff]   ;;  %v2971_v41 = vld [vmem:[%s3880_s10 + $0xf4] ss:$8 sps:$4 sm:$0xff]  }
  0xe0   :  { %v275_v10 = vpop.f32.mrf.mxu0  ;;  %v369_v57 = vadd.f32 %v368_v8, %v2619_v25  ;;  %v392_v55 = vmax.f32 %v367_v39, 0.0  ;;  %v2647_v8 = vadd.f32 %v2597_v47, %v159_v36  ;;  %v2674_v36 = vld [vmem:[%s3881_s11 + $0x74] ss:$8 sps:$4 sm:$0xff]   ;;  %v2679_v39 = vld [vmem:[%s3881_s11 + $0x70] ss:$8 sps:$4 sm:$0xff]   ;;  %4042 = vst [vmem:[#allocation27_spill] sm:$0xff] %v2763_v61 }
  0xe1   :  { %v370_v11 = vpop.f32.mrf.mxu1  ;;  %4021 = vst [vmem:[#allocation6_spill] sm:$0xff] %v2607_v15  ;;  %v2611_v18 = vadd.f32 %v275_v10, %v184_v62  ;;  %4033 = vst [vmem:[#allocation18_spill] sm:$0xff] %v2639_v7  ;;  %v355_v56 = vadd.f32 %v2605_v54, %v2639_v7  ;;  %v386_v21 = vmax.f32 %v351_v51, 0.0  ;;  %706 = vmatprep.subr.bf16.mxu0 %v2674_v36  ;;  %v2781_v51 = vld [vmem:[%s3881_s11 + $0xe4] ss:$8 sps:$4 sm:$0xff]  }
  0xe2   :  { %v277_v12 = vpop.f32.mrf.mxu0  ;;  %v371_v29 = vadd.f32 %v370_v11, %v2607_v15  ;;  %4035 = vst [vmem:[#allocation20_spill] sm:$0xff] %v2647_v8  ;;  %v393_v11 = vmax.f32 %v369_v57, 0.0  ;;  %707 = vmatpush1.bf16.msra.mxu0 %v2679_v39  ;;  %v2691_v57 = vld [vmem:[%s3881_s11 + $0x60] ss:$8 sps:$4 sm:$0xff]   ;;  %4045 = vst [vmem:[#allocation30_spill] sm:$0xff] %v2781_v51 }
  0xe3   :  { %v374_v13 = vpop.f32.mrf.mxu1  ;;  %v2609_v17 = vadd.f32 %v277_v12, %v184_v62  ;;  %4023 = vst [vmem:[#allocation8_spill] sm:$0xff] %v2611_v18  ;;  %v2965_v7 = vld [vmem:[%s3880_s10] ss:$8 sps:$4 sm:$0xff]   ;;  %4059 = vst [vmem:[#allocation44_spill] sm:$0xff] %v2971_v41  ;;  %v3001_v25 = vld [vmem:[%s3880_s10 + $0xd0] ss:$8 sps:$4 sm:$0xff]  }
  0xe4   :  { %v279_v19 = vpop.f32.mrf.mxu0  ;;  %v375_v34 = vadd.f32 %v374_v13, %v2611_v18  ;;  %v394_v60 = vmax.f32 %v371_v29, 0.0  ;;  %v390_v13 = vmax.f32 %v361_v59, 0.0  ;;  %v2703_v59 = vld [vmem:[%s3881_s11 + $0x50] ss:$8 sps:$4 sm:$0xff]   ;;  %4058 = vst [vmem:[#allocation43_spill] sm:$0xff] %v2965_v7  ;;  %4064 = vst [vmem:[#allocation49_spill] sm:$0xff] %v3001_v25 }
  0xe5   :  { %4022 = vst [vmem:[#allocation7_spill] sm:$0xff] %v2609_v17  ;;  %v376_v20 = vpop.f32.mrf.mxu1  ;;  %v2615_v23 = vadd.f32 %v279_v19, %v189_v9  ;;  %v349_v19 = vadd.f32 %v2601_v50, %v2647_v8  ;;  %v124_v50 = vld [vmem:[%s3879_s7] sm:$0xf]  ;;  %v2953_v8 = vld [vmem:[%s3880_s10 + $0x10] ss:$8 sps:$4 sm:$0xff]   ;;  %4066 = vst [vmem:[#allocation51_spill] sm:$0xff] %v3013_v22 }
  0xe6   :  { %v281_v26 = vpop.f32.mrf.mxu0  ;;  %v377_v30 = vadd.f32 %v376_v20, %v2609_v17  ;;  %v395_v4 = vmax.f32 %v375_v34, 0.0  ;;  %v404_v0 = vpack.c.bf16 %v394_v60, %v392_v55  ;;  %v403_v20 = vpack.c.bf16 %v393_v11, %v391_v14  ;;  %v2709_v60 = vld [vmem:[%s3881_s11 + $0x44] ss:$8 sps:$4 sm:$0xff]   ;;  %v2751_v55 = vld [vmem:[%s3881_s11 + $0x10] ss:$8 sps:$4 sm:$0xff]  }
  0xe7   :  { %4025 = vst [vmem:[#allocation10_spill] sm:$0xff] %v2615_v23  ;;  %v378_v28 = vpop.f32.mrf.mxu1  ;;  %v2623_v31 = vadd.f32 %v281_v26, %v189_v9  ;;  %v2643_v9 = vadd.f32 %v2593_v45, %v154_v5  ;;  %v2653_v45 = vadd.f32 %v2591_v44, %v154_v5  ;;  %v402_v26 = vpack.c.bf16 %v390_v13, %v388_v58  ;;  %v2727_v5 = vld [vmem:[%s3881_s11 + $0x30] ss:$8 sps:$4 sm:$0xff]   ;;  %v2769_v11 = vld [vmem:[%s3881_s11 + $0xf4] ss:$8 sps:$4 sm:$0xff]  }
  0xe8   :  { %v379_v32 = vadd.f32 %v378_v28, %v2615_v23  ;;  %v396_v63 = vmax.f32 %v377_v30, 0.0  ;;  %v387_v28 = vmax.f32 %v355_v56, 0.0  ;;  %v385_v29 = vmax.f32 %v349_v19, 0.0  ;;  %4040 = vst [vmem:[#allocation25_spill] sm:$0xff] %v2751_v55  ;;  %4043 = vst [vmem:[#allocation28_spill] sm:$0xff] %v2769_v11 }
  0xe9   :  { %4028 = vst [vmem:[#allocation13_spill] sm:$0xff] %v2623_v31  ;;  %v380_v35 = vpop.f32.mrf.mxu1  ;;  %4034 = vst [vmem:[#allocation19_spill] sm:$0xff] %v2643_v9  ;;  %v347_v47 = vadd.f32 %v2599_v48, %v2643_v9  ;;  %v345_v44 = vadd.f32 %v2595_v46, %v2653_v45  ;;  %v3889_v46 = vmov 0.0   ;;  %v2787_v13 = vld [vmem:[%s3881_s11 + $0xe0] ss:$8 sps:$4 sm:$0xff]  }
  0xea   :  { %v381_v40 = vadd.f32 %v380_v35, %v2623_v31  ;;  %v397_v62 = vmax.f32 %v379_v32, 0.0  ;;  %4036 = vst [vmem:[#allocation21_spill] sm:$0xff] %v2653_v45  ;;  %v401_v30 = vpack.c.bf16 %v389_v52, %v387_v28  ;;  %v2666_v35 = vpack.c.bf16 %v124_v50, %v124_v50  ;;  %4046 = vst [vmem:[#allocation31_spill] sm:$0xff] %v2787_v13  ;;  %v2799_v56 = vld [vmem:[%s3881_s11 + $0xd0] ss:$8 sps:$4 sm:$0xff]  }
  0xeb   :  { %v384_v54 = vmax.f32 %v347_v47, 0.0  ;;  %v383_v48 = vmax.f32 %v345_v44, 0.0  ;;  %4048 = vst [vmem:[#allocation33_spill] sm:$0xff] %v2799_v56  ;;  %v2805_v14 = vld [vmem:[%s3881_s11 + $0xc4] ss:$8 sps:$4 sm:$0xff]  }
  0xec   :  { %v398_v1 = vmax.f32 %v381_v40, 0.0  ;;  %v405_v12 = vpack.c.bf16 %v397_v62, %v395_v4  ;;  %4037 = vst [vmem:[#allocation22_spill] sm:$0xff] %v2666_v35  ;;  %v2685_v40 = vld [vmem:[%s3881_s11 + $0x64] ss:$8 sps:$4 sm:$0xff]   ;;  %v2697_v62 = vld [vmem:[%s3881_s11 + $0x54] ss:$8 sps:$4 sm:$0xff]  }
  0xed   :  { %v400_v32 = vpack.c.bf16 %v386_v21, %v384_v54  ;;  %v399_v34 = vpack.c.bf16 %v385_v29, %v383_v48  ;;  %708 = vmatprep.subr.bf16.mxu0 %v2685_v40  ;;  %v2739_v4 = vld [vmem:[%s3881_s11 + $0x20] ss:$8 sps:$4 sm:$0xff]   ;;  %4049 = vst [vmem:[#allocation34_spill] sm:$0xff] %v2805_v14  ;;  %v2817_v58 = vld [vmem:[%s3881_s11 + $0xb4] ss:$8 sps:$4 sm:$0xff]  }
  0xee   :  { %v406_v10 = vpack.c.bf16 %v398_v1, %v396_v63  ;;  %709 = vmatpush1.bf16.msra.mxu0 %v2691_v57  ;;  %v2715_v63 = vld [vmem:[%s3881_s11 + $0x40] ss:$8 sps:$4 sm:$0xff]   ;;  %v2721_v1 = vld [vmem:[%s3881_s11 + $0x34] ss:$8 sps:$4 sm:$0xff]   ;;  %4038 = vst [vmem:[#allocation23_spill] sm:$0xff] %v2739_v4  ;;  %4051 = vst [vmem:[#allocation36_spill] sm:$0xff] %v2817_v58 }
  0xef   :  { %710 = vmatprep.subr.bf16.mxu0 %v2697_v62  ;;  %v2811_v47 = vld [vmem:[%s3881_s11 + $0xc0] ss:$8 sps:$4 sm:$0xff]   ;;  %v2823_v19 = vld [vmem:[%s3881_s11 + $0xb0] ss:$8 sps:$4 sm:$0xff]   ;;  %v2829_v52 = vld [vmem:[%s3881_s11 + $0xa4] ss:$8 sps:$4 sm:$0xff]  }
  0xf0   :  { %424 = vmatprep.subr.bf16.mxu1 %v406_v10  ;;  %v2757_v10 = vld [vmem:[%s3881_s11 + $0x4] ss:$8 sps:$4 sm:$0xff]   ;;  %4050 = vst [vmem:[#allocation35_spill] sm:$0xff] %v2811_v47  ;;  %4052 = vst [vmem:[#allocation37_spill] sm:$0xff] %v2823_v19  ;;  %v2841_v21 = vld [vmem:[%s3881_s11 + $0x94] ss:$8 sps:$4 sm:$0xff]  }
  0xf1   :  { %425 = vmatpush1.bf16.msra.mxu1 %v405_v12  ;;  %4041 = vst [vmem:[#allocation26_spill] sm:$0xff] %v2757_v10  ;;  %v2775_v12 = vld [vmem:[%s3881_s11 + $0xf0] ss:$8 sps:$4 sm:$0xff]   ;;  %4053 = vst [vmem:[#allocation38_spill] sm:$0xff] %v2829_v52  ;;  %v2947_v45 = vld [vmem:[%s3880_s10 + $0x14] ss:$8 sps:$4 sm:$0xff]  }
  0xf2   :  { %426 = vmatprep.subr.bf16.mxu1 %v404_v0  ;;  %711 = vmatpush1.bf16.msra.mxu0 %v2703_v59  ;;  %4044 = vst [vmem:[#allocation29_spill] sm:$0xff] %v2775_v12  ;;  %v2793_v0 = vld [vmem:[%s3881_s11 + $0xd4] ss:$8 sps:$4 sm:$0xff]   ;;  %4055 = vst [vmem:[#allocation40_spill] sm:$0xff] %v2841_v21  ;;  %v2850_v54 = vld [vmem:[%s3881_s11 + $0x90] ss:$8 sps:$4 sm:$0xff]  }
  0xf3   :  { %712 = vmatprep.subr.bf16.mxu0 %v2709_v60  ;;  %4047 = vst [vmem:[#allocation32_spill] sm:$0xff] %v2793_v0  ;;  %4057 = vst [vmem:[#allocation42_spill] sm:$0xff] %v2850_v54  ;;  %v2959_v9 = vld [vmem:[%s3880_s10 + $0x4] ss:$8 sps:$4 sm:$0xff]   ;;  %v3019_v18 = vld [vmem:[%s3880_s10 + $0xb4] ss:$8 sps:$4 sm:$0xff]  }
  0xf4   :  { %v3007_v31 = vld [vmem:[%s3880_s10 + $0xc4] ss:$8 sps:$4 sm:$0xff]   ;;  %4067 = vst [vmem:[#allocation52_spill] sm:$0xff] %v3019_v18  ;;  %v3025_v23 = vld [vmem:[%s3880_s10 + $0xb0] ss:$8 sps:$4 sm:$0xff]  }
  0xf5   :  { %427 = vmatpush1.bf16.msra.mxu1 %v403_v20  ;;  %v2835_v20 = vld [vmem:[%s3881_s11 + $0xa0] ss:$8 sps:$4 sm:$0xff]   ;;  %4065 = vst [vmem:[#allocation50_spill] sm:$0xff] %v3007_v31  ;;  %4068 = vst [vmem:[#allocation53_spill] sm:$0xff] %v3025_v23  ;;  %v3031_v17 = vld [vmem:[%s3880_s10 + $0xa4] ss:$8 sps:$4 sm:$0xff]  }
  0xf6   :  { %428 = vmatprep.subr.bf16.mxu1 %v402_v26  ;;  %713 = vmatpush1.bf16.msra.mxu0 %v2715_v63  ;;  %4054 = vst [vmem:[#allocation39_spill] sm:$0xff] %v2835_v20  ;;  %v2843_v26 = vpop.permute.xlu0 %409  ;;  %4069 = vst [vmem:[#allocation54_spill] sm:$0xff] %v3031_v17  ;;  %v3037_v15 = vld [vmem:[%s3880_s10 + $0xa0] ss:$8 sps:$4 sm:$0xff]  }
  0xf7   :  { %714 = vmatprep.subr.bf16.mxu0 %v2721_v1  ;;  %4056 = vst [vmem:[#allocation41_spill] sm:$0xff] %v2843_v26  ;;  %4070 = vst [vmem:[#allocation55_spill] sm:$0xff] %v3037_v15 }
  0xf9   :  { %429 = vmatpush1.bf16.msra.mxu1 %v401_v30 }
  0xfa   :  { %430 = vmatprep.subr.bf16.mxu1 %v400_v32  ;;  %715 = vmatpush1.bf16.msra.mxu0 %v2727_v5 }
  0xfb   :  { %716 = vmatprep.subr.bf16.mxu0 %v2733_v53 }
  0xfd   :  { %431 = vmatpush1.bf16.msra.mxu1 %v399_v34  ;;  %v2861_v34 = vld [vmem:[%s3880_s10 + $0x74] ss:$8 sps:$4 sm:$0xff]  }
  0xfe   :  { %717 = vmatpush1.bf16.msra.mxu0 %v2739_v4 }
  0xff   :  { %718 = vmatprep.subr.bf16.mxu0 %v2745_v49 }
 0x100   :  { %2124 = vmatmul.mubr.msk.bf16.vlgmr.msra.gmra.mxu1 %vm412_vm4, %v2666_v35  ;;  %v2941_v35 = vld [vmem:[%s3880_s10 + $0x20] ss:$8 sps:$4 sm:$0xff]  }
 0x101   :  { %535 = vmatprep.mubr.f32.mxu1 %v3889_v46  ;;  %v2929_v46 = vld [vmem:[%s3880_s10 + $0x30] ss:$8 sps:$4 sm:$0xff]  }
 0x102   :  { %719 = vmatpush1.bf16.msra.mxu0 %v2751_v55 }
 0x103   :  { %720 = vmatprep.subr.bf16.mxu0 %v2757_v10 }
 0x106   :  { %721 = vmatpush1.bf16.msra.mxu0 %v2763_v61 }
 0x107   :  { %722 = vmatprep.subr.bf16.mxu0 %v2769_v11 }
 0x10a   :  { %723 = vmatpush2.bf16.msra.mxu0 %v2775_v12 }
 0x10b   :  { %724 = vmatprep.subr.bf16.mxu0 %v2781_v51 }
 0x10e   :  { %725 = vmatpush2.bf16.msra.mxu0 %v2787_v13 }
 0x10f   :  { %726 = vmatprep.subr.bf16.mxu0 %v2793_v0 }
 0x112   :  { %727 = vmatpush2.bf16.msra.mxu0 %v2799_v56 }
 0x113   :  { %728 = vmatprep.subr.bf16.mxu0 %v2805_v14 }
 0x116   :  { %729 = vmatpush2.bf16.msra.mxu0 %v2811_v47 }
 0x117   :  { %730 = vmatprep.subr.bf16.mxu0 %v2817_v58 }
 0x11a   :  { %731 = vmatpush2.bf16.msra.mxu0 %v2823_v19 }
 0x11b   :  { %732 = vmatprep.subr.bf16.mxu0 %v2829_v52 }
 0x11e   :  { %733 = vmatpush2.bf16.msra.mxu0 %v2835_v20  ;;  %v3076_v20 = vld [vmem:[%s3881_s11 + $0x80] ss:$8 sps:$4 sm:$0xff]  }
 0x11f   :  { %734 = vmatprep.subr.bf16.mxu0 %v2841_v21  ;;  %v3071_v21 = vld [vmem:[%s3881_s11 + $0x84] ss:$8 sps:$4 sm:$0xff]   ;;  %4076 = vst [vmem:[#allocation61_spill] sm:$0xff] %v3076_v20 }
 0x120   :  { %4075 = vst [vmem:[#allocation60_spill] sm:$0xff] %v3071_v21 }
 0x122   :  { %735 = vmatpush2.bf16.msra.mxu0 %v2850_v54 }
 0x123   :  { %736 = vmatprep.subr.bf16.mxu0 %v3071_v21 }
 0x126   :  { %737 = vmatpush2.bf16.msra.mxu0 %v3076_v20 }
 0x1c0   :  { %v450_v44 = vpop.f32.mrf.mxu1 }
 0x1c1   :  { %v451_v28 = vadd.f32 %v450_v44, %v2843_v26  ;;  %v2867_v44 = vld [vmem:[%s3882_s9] sm:$0xf] }
 0x1c2   :  { %v452_v29 = vpop.f32.mrf.mxu1 }
 0x1c3   :  { %v453_v30 = vadd.f32 %v452_v29, %v2843_v26  ;;  %v2855_v48 = vadd.f32 %v451_v28, %v2471_v2  ;;  %v2872_v2 = vld [vmem:[%s3880_s10 + $0x70] ss:$8 sps:$4 sm:$0xff]   ;;  %v2879_v29 = vld [vmem:[%s3880_s10 + $0x64] ss:$8 sps:$4 sm:$0xff]  }
 0x1c4   :  { %v454_v32 = vpop.f32.mrf.mxu1  ;;  %v2935_v26 = vld [vmem:[%s3880_s10 + $0x24] ss:$8 sps:$4 sm:$0xff]  }
 0x1c5   :  { %v458_v50 = vadd.f32 %v453_v30, %v2477_v6  ;;  %v2899_v30 = vld [vmem:[%s3880_s10 + $0x54] ss:$8 sps:$4 sm:$0xff]   ;;  %v2905_v32 = vld [vmem:[%s3880_s10 + $0x50] ss:$8 sps:$4 sm:$0xff]   ;;  %v542_v54 = vpack.c.bf16 %v2855_v48, %v2855_v48 }
 0x1c6   :  { %v455_v3 = vpop.f32.mrf.mxu1 }
 0x1c7   :  { %v461_v6 = vcombine.low %v2855_v48, %v458_v50  ;;  %2125 = vmatprep.subr.msk.mxu1 %vm204_vm0, %v458_v50  ;;  %v543_v28 = vpack.c.bf16 %v458_v50, %v458_v50  ;;  %v2893_v3 = vld [vmem:[%s3880_s10 + $0x60] ss:$8 sps:$4 sm:$0xff]   ;;  %v2911_v50 = vld [vmem:[%s3880_s10 + $0x44] ss:$8 sps:$4 sm:$0xff]  }
 0x1c8   :  { %2126 = vmatpush1.msk.msra.mxu1 %vm204_vm0, %v2855_v48 }
 0x1c9   :  { %463 = vst [vmem:[%s3883_s13] sm:$0xff] %v461_v6  ;;  %2127 = vmatmul.mubr.msk.f32.vlgmr.msra.gmra.mxu1 %vm290_vm3, %v2867_v44  ;;  %907 = vmatprep.subr.bf16.mxu1 %v2861_v34  ;;  %v2917_v6 = vld [vmem:[%s3880_s10 + $0x40] ss:$8 sps:$4 sm:$0xff]  }
 0x1ca   :  { %908 = vmatpush1.bf16.msra.mxu1 %v2872_v2  ;;  %939 = vmatprep.mubr.bf16.mxu1 %v543_v28  ;;  %v2923_v28 = vld [vmem:[%s3880_s10 + $0x34] ss:$8 sps:$4 sm:$0xff]  }
 0x1cb   :  { %909 = vmatprep.subr.bf16.mxu1 %v2879_v29 }
 0x1ce   :  { %910 = vmatpush1.bf16.msra.mxu1 %v2893_v3 }
 0x1cf   :  { %911 = vmatprep.subr.bf16.mxu1 %v2899_v30 }
 0x1d2   :  { %912 = vmatpush1.bf16.msra.mxu1 %v2905_v32 }
 0x1d3   :  { %913 = vmatprep.subr.bf16.mxu1 %v2911_v50 }
 0x1d6   :  { %914 = vmatpush1.bf16.msra.mxu1 %v2917_v6 }
 0x1d7   :  { %915 = vmatprep.subr.bf16.mxu1 %v2923_v28 }
 0x1da   :  { %916 = vmatpush1.bf16.msra.mxu1 %v2929_v46 }
 0x1db   :  { %917 = vmatprep.subr.bf16.mxu1 %v2935_v26 }
 0x1de   :  { %918 = vmatpush1.bf16.msra.mxu1 %v2941_v35 }
 0x1df   :  { %919 = vmatprep.subr.bf16.mxu1 %v2947_v45 }
 0x1e2   :  { %920 = vmatpush1.bf16.msra.mxu1 %v2953_v8 }
 0x1e3   :  { %921 = vmatprep.subr.bf16.mxu1 %v2959_v9 }
 0x1e6   :  { %922 = vmatpush1.bf16.msra.mxu1 %v2965_v7 }
 0x1e7   :  { %923 = vmatprep.subr.bf16.mxu1 %v2971_v41 }
 0x1ea   :  { %924 = vmatpush2.bf16.msra.mxu1 %v2977_v42 }
 0x1eb   :  { %925 = vmatprep.subr.bf16.mxu1 %v2983_v38 }
 0x1ee   :  { %926 = vmatpush2.bf16.msra.mxu1 %v2989_v33 }
 0x1ef   :  { %927 = vmatprep.subr.bf16.mxu1 %v2995_v24 }
 0x1f2   :  { %928 = vmatpush2.bf16.msra.mxu1 %v3001_v25 }
 0x1f3   :  { %929 = vmatprep.subr.bf16.mxu1 %v3007_v31 }
 0x1f6   :  { %930 = vmatpush2.bf16.msra.mxu1 %v3013_v22 }
 0x1f7   :  { %931 = vmatprep.subr.bf16.mxu1 %v3019_v18 }
 0x1fa   :  { %932 = vmatpush2.bf16.msra.mxu1 %v3025_v23 }
 0x1fb   :  { %933 = vmatprep.subr.bf16.mxu1 %v3031_v17 }
 0x1fe   :  { %934 = vmatpush2.bf16.msra.mxu1 %v3037_v15 }
 0x1ff   :  { %935 = vmatprep.subr.bf16.mxu1 %v3043_v43 }
 0x202   :  { %936 = vmatpush2.bf16.msra.mxu1 %v3049_v37 }
 0x203   :  { %937 = vmatprep.subr.bf16.mxu1 %v3055_v27 }
 0x206   :  { %938 = vmatpush2.bf16.msra.mxu1 %v3061_v16 }
 0x207   :  { %1037 = vmatprep.subr.bf16.mxu1 %v2861_v34 }
 0x209   :  { %940 = vmatmul.mubr.bf16.vlgmr.msra.gmra.mxu1 %v542_v54 }
 0x20a   :  { %1038 = vmatpush1.bf16.msra.mxu1 %v2872_v2 }
 0x20b   :  { %1039 = vmatprep.subr.bf16.mxu1 %v2879_v29 }
 0x20e   :  { %1040 = vmatpush1.bf16.msra.mxu1 %v2893_v3 }
 0x20f   :  { %1041 = vmatprep.subr.bf16.mxu1 %v2899_v30 }
 0x212   :  { %1042 = vmatpush1.bf16.msra.mxu1 %v2905_v32 }
 0x213   :  { %1043 = vmatprep.subr.bf16.mxu1 %v2911_v50 }
 0x216   :  { %1044 = vmatpush1.bf16.msra.mxu1 %v2917_v6 }
 0x217   :  { %1045 = vmatprep.subr.bf16.mxu1 %v2923_v28 }
 0x21a   :  { %1046 = vmatpush1.bf16.msra.mxu1 %v2929_v46 }
 0x21b   :  { %1047 = vmatprep.subr.bf16.mxu1 %v2935_v26 }
 0x21e   :  { %1048 = vmatpush1.bf16.msra.mxu1 %v2941_v35 }
 0x21f   :  { %1049 = vmatprep.subr.bf16.mxu1 %v2947_v45 }
 0x222   :  { %1050 = vmatpush1.bf16.msra.mxu1 %v2953_v8 }
 0x223   :  { %1051 = vmatprep.subr.bf16.mxu1 %v2959_v9 }
 0x226   :  { %1052 = vmatpush1.bf16.msra.mxu1 %v2965_v7 }
 0x227   :  { %1053 = vmatprep.subr.bf16.mxu1 %v2971_v41 }
 0x22a   :  { %1054 = vmatpush2.bf16.msra.mxu1 %v2977_v42 }
 0x22b   :  { %1055 = vmatprep.subr.bf16.mxu1 %v2983_v38 }
 0x22e   :  { %1056 = vmatpush2.bf16.msra.mxu1 %v2989_v33 }
 0x22f   :  { %1057 = vmatprep.subr.bf16.mxu1 %v2995_v24 }
 0x232   :  { %1058 = vmatpush2.bf16.msra.mxu1 %v3001_v25 }
 0x233   :  { %1059 = vmatprep.subr.bf16.mxu1 %v3007_v31 }
 0x236   :  { %1060 = vmatpush2.bf16.msra.mxu1 %v3013_v22 }
 0x237   :  { %1061 = vmatprep.subr.bf16.mxu1 %v3019_v18  ;;  %v4077_v18 = vmov 0.0  }
 0x23a   :  { %1062 = vmatpush2.bf16.msra.mxu1 %v3025_v23 }
 0x23b   :  { %1063 = vmatprep.subr.bf16.mxu1 %v3031_v17 }
 0x23e   :  { %1064 = vmatpush2.bf16.msra.mxu1 %v3037_v15 }
 0x23f   :  { %1065 = vmatprep.subr.bf16.mxu1 %v3043_v43 }
 0x242   :  { %1066 = vmatpush2.bf16.msra.mxu1 %v3049_v37  ;;  %v45_v37 = vld [vmem:[%s3884_s3] sm:$0xff] }
 0x243   :  { %1067 = vmatprep.subr.bf16.mxu1 %v3055_v27 }
 0x246   :  { %1068 = vmatpush2.bf16.msra.mxu1 %v3061_v16  ;;  %v44_v16 = vld [vmem:[%s3885_s2] sm:$0xff] }
 0x247   :  { %v3120_v33 = vmul.f32 %v45_v37, %v44_v16  ;;  %v4080_v16 = vmov 0  }
 0x249   :  { %4079 = vst [vmem:[#allocation63_spill] sm:$0xff] %v3120_v33 }
 0x289   :  { %v537_v54 = vpop.f32.mrf.mxu1 }
 0x28a   :  { %v544_v22 = vpack.c.bf16 %v537_v54, %v537_v54  ;;  %v3118_v54 = vsub.f32 1.0, %v45_v37  ;;  %v4081_v37 = vld [vmem:[#allocation39_spill] sm:$0xff] }
 0x28b   :  { %v539_v48 = vpop.f32.mrf.mxu1 }
 0x28c   :  { %v545_v31 = vpack.c.bf16 %v539_v48, %v539_v48  ;;  %4078 = vst [vmem:[#allocation62_spill] sm:$0xff] %v3118_v54 }
 0x28e   :  { %738 = vmatprep.mubr.bf16.mxu0 %v545_v31 }
 0x28f   :  { %739 = vmatmul.mubr.bf16.vlgmr.msra.gmra.mxu0 %v544_v22 }
 0x290   :  { %1027 = vmatprep.mubr.f32.mxu0 %v4077_v18 }
 0x2c9   :  { %v941_v23 = vpop.f32.mrf.mxu1 }
 0x2cb   :  { %v943_v17 = vpop.f32.mrf.mxu1 }
 0x2cd   :  { %v945_v25 = vpop.f32.mrf.mxu1 }
 0x2cf   :  { %v946_v15 = vpop.f32.mrf.mxu1 }
 0x34f   :  { %v740_v24 = vpop.f32.mrf.mxu0 }
 0x350   :  { %v942_v48 = vadd.f32 %v941_v23, %v740_v24 }
 0x351   :  { %v742_v27 = vpop.f32.mrf.mxu0 }
 0x352   :  { %v944_v22 = vadd.f32 %v943_v17, %v742_v27  ;;  %v4083_v17 = vld [vmem:[#allocation42_spill] sm:$0xff] }
 0x353   :  { %v744_v31 = vpop.f32.mrf.mxu0 }
 0x354   :  { %v950_v43 = vcombine.low %v942_v48, %v944_v22 }
 0x355   :  { %v745_v25 = vpop.f32.mrf.mxu0 }
 0x356   :  { %v952_v15 = vmul.f32 %v950_v43, %v3118_v54  ;;  %v4082_v43 = vld [vmem:[#allocation40_spill] sm:$0xff] }
 0x358   :  { %v954_v38 = vadd.f32 %v3120_v33, %v952_v15 }
 0x35a   :  { %2192 = vst [vmem:[%s3883_s13 + $0x8] sm:$0xff] %v954_v38  ;;  %v958_v42 = vcombine.high %v954_v38, %v954_v38  ;;  %v1035_v27 = vpack.c.bf16 %v954_v38, %v954_v38 }
 0x35c   :  { %2193 = vmatprep.subr.msk.mxu0 %vm204_vm0, %v958_v42  ;;  %v1036_v23 = vpack.c.bf16 %v958_v42, %v958_v42 }
 0x35d   :  { %2194 = vmatpush1.msk.msra.mxu0 %vm204_vm0, %v954_v38 }
 0x35e   :  { %2195 = vmatmul.mubr.msk.f32.vlgmr.msra.gmra.mxu0 %vm290_vm3, %v2867_v44  ;;  %1069 = vmatprep.mubr.bf16.mxu1 %v1036_v23 }
 0x35f   :  { %1070 = vmatmul.mubr.bf16.vlgmr.msra.gmra.mxu1 %v1035_v27  ;;  %1080 = vmatprep.subr.bf16.mxu0 %v2674_v36 }
 0x360   :  { %1081 = vmatpush1.bf16.msra.mxu0 %v2679_v39  ;;  %1163 = vmatprep.mubr.bf16.mxu1 %v4080_v16 }
 0x361   :  { %1082 = vmatprep.subr.bf16.mxu0 %v2685_v40 }
 0x364   :  { %1083 = vmatpush1.bf16.msra.mxu0 %v2691_v57 }
 0x365   :  { %1084 = vmatprep.subr.bf16.mxu0 %v2697_v62 }
 0x368   :  { %1085 = vmatpush1.bf16.msra.mxu0 %v2703_v59 }
 0x369   :  { %1086 = vmatprep.subr.bf16.mxu0 %v2709_v60 }
 0x36c   :  { %1087 = vmatpush1.bf16.msra.mxu0 %v2715_v63 }
 0x36d   :  { %1088 = vmatprep.subr.bf16.mxu0 %v2721_v1 }
 0x370   :  { %1089 = vmatpush1.bf16.msra.mxu0 %v2727_v5 }
 0x371   :  { %1090 = vmatprep.subr.bf16.mxu0 %v2733_v53 }
 0x374   :  { %1091 = vmatpush1.bf16.msra.mxu0 %v2739_v4 }
 0x375   :  { %1092 = vmatprep.subr.bf16.mxu0 %v2745_v49 }
 0x378   :  { %1093 = vmatpush1.bf16.msra.mxu0 %v2751_v55 }
 0x379   :  { %1094 = vmatprep.subr.bf16.mxu0 %v2757_v10 }
 0x37c   :  { %1095 = vmatpush1.bf16.msra.mxu0 %v2763_v61 }
 0x37d   :  { %1096 = vmatprep.subr.bf16.mxu0 %v2769_v11 }
 0x380   :  { %1097 = vmatpush2.bf16.msra.mxu0 %v2775_v12 }
 0x381   :  { %1098 = vmatprep.subr.bf16.mxu0 %v2781_v51 }
 0x384   :  { %1099 = vmatpush2.bf16.msra.mxu0 %v2787_v13 }
 0x385   :  { %1100 = vmatprep.subr.bf16.mxu0 %v2793_v0 }
 0x388   :  { %1101 = vmatpush2.bf16.msra.mxu0 %v2799_v56 }
 0x389   :  { %1102 = vmatprep.subr.bf16.mxu0 %v2805_v14 }
 0x38c   :  { %1103 = vmatpush2.bf16.msra.mxu0 %v2811_v47 }
 0x38d   :  { %1104 = vmatprep.subr.bf16.mxu0 %v2817_v58 }
 0x390   :  { %1105 = vmatpush2.bf16.msra.mxu0 %v2823_v19 }
 0x391   :  { %1106 = vmatprep.subr.bf16.mxu0 %v2829_v52 }
 0x394   :  { %1107 = vmatpush2.bf16.msra.mxu0 %v4081_v37 }
 0x395   :  { %1108 = vmatprep.subr.bf16.mxu0 %v4082_v43 }
 0x398   :  { %1109 = vmatpush2.bf16.msra.mxu0 %v4083_v17 }
 0x399   :  { %1110 = vmatprep.subr.bf16.mxu0 %v3071_v21 }
 0x39c   :  { %1111 = vmatpush2.bf16.msra.mxu0 %v3076_v20 }
 0x41e   :  { %v1029_v24 = vpop.f32.mrf.mxu0 }
 0x41f   :  { %v1071_v38 = vpop.f32.mrf.mxu1  ;;  %v1078_v31 = vpack.c.bf16 %v1029_v24, %v1029_v24 }
 0x420   :  { %v1031_v42 = vpop.f32.mrf.mxu0 }
 0x421   :  { %v1079_v48 = vpack.c.bf16 %v1031_v42, %v1031_v42  ;;  %v1073_v22 = vpop.f32.mrf.mxu1 }
 0x423   :  { %v1075_v25 = vpop.f32.mrf.mxu1  ;;  %1112 = vmatprep.mubr.bf16.mxu0 %v1079_v48 }
 0x424   :  { %1113 = vmatmul.mubr.bf16.vlgmr.msra.gmra.mxu0 %v1078_v31 }
 0x425   :  { %v1076_v15 = vpop.f32.mrf.mxu1  ;;  %1260 = vmatprep.mubr.bf16.mxu0 %v4080_v16 }
 0x4e4   :  { %v1114_v23 = vpop.f32.mrf.mxu0 }
 0x4e5   :  { %v3165_v27 = vsub.f32 %v1071_v38, %v1114_v23  ;;  %v4084_v38 = vld [vmem:[#allocation2_spill] sm:$0xff] }
 0x4e6   :  { %v1116_v33 = vpop.f32.mrf.mxu0 }
 0x4e7   :  { %v1123_v54 = vpack.c.bf16 %v3165_v27, %v3165_v27  ;;  %v3169_v41 = vsub.f32 %v1073_v22, %v1116_v33  ;;  %v4085_v33 = vld [vmem:[#allocation3_spill] sm:$0xff] }
 0x4e8   :  { %v1118_v7 = vpop.f32.mrf.mxu0 }
 0x4e9   :  { %v1124_v42 = vpack.c.bf16 %v3169_v41, %v3169_v41  ;;  %v1126_v48 = vsel %vm303_vm1, %v1123_v54, 0  ;;  %v4086_v7 = vld [vmem:[#allocation4_spill] sm:$0xff] }
 0x4ea   :  { %v1119_v24 = vpop.f32.mrf.mxu0 }
 0x4eb   :  { %2196 = vmatprep.subr.msk.bf16.mxu1 %vm303_vm1, %v1124_v42 }
 0x4ec   :  { %1146 = vmatpush1.bf16.msra.mxu1 %v1126_v48 }
 0x4ed   :  { %1356 = vmatprep.subr.bf16.mxu1 %v2674_v36  ;;  %v4087_v36 = vld [vmem:[#allocation5_spill] sm:$0xff] }
 0x4ef   :  { %2197 = vmatmul.mubr.msk.bf16.vlgmr.msra.gmra.mxu1 %vm290_vm3, %v4084_v38  ;;  %v4088_v38 = vld [vmem:[#allocation6_spill] sm:$0xff] }
 0x4f0   :  { %1173 = vmatprep.mubr.bf16.mxu1 %v4080_v16  ;;  %1357 = vmatpush1.bf16.msra.mxu1 %v2679_v39 }
 0x4f1   :  { %1358 = vmatprep.subr.bf16.mxu1 %v2685_v40 }
 0x4f4   :  { %1359 = vmatpush1.bf16.msra.mxu1 %v2691_v57 }
 0x4f5   :  { %1360 = vmatprep.subr.bf16.mxu1 %v2697_v62 }
 0x4f7   :  { %2198 = vmatmul.mubr.msk.bf16.gmra.mxu1 %vm290_vm3, %v4085_v33 }
 0x4f8   :  { %1183 = vmatprep.mubr.bf16.mxu1 %v4080_v16  ;;  %1361 = vmatpush1.bf16.msra.mxu1 %v2703_v59 }
 0x4f9   :  { %1362 = vmatprep.subr.bf16.mxu1 %v2709_v60 }
 0x4fc   :  { %1363 = vmatpush1.bf16.msra.mxu1 %v2715_v63 }
 0x4fd   :  { %1364 = vmatprep.subr.bf16.mxu1 %v2721_v1 }
 0x4ff   :  { %2199 = vmatmul.mubr.msk.bf16.gmra.mxu1 %vm290_vm3, %v4086_v7 }
 0x500   :  { %1193 = vmatprep.mubr.bf16.mxu1 %v4080_v16  ;;  %1365 = vmatpush1.bf16.msra.mxu1 %v2727_v5 }
 0x501   :  { %1366 = vmatprep.subr.bf16.mxu1 %v2733_v53 }
 0x504   :  { %1367 = vmatpush1.bf16.msra.mxu1 %v2739_v4 }
 0x505   :  { %1368 = vmatprep.subr.bf16.mxu1 %v2745_v49 }
 0x507   :  { %2200 = vmatmul.mubr.msk.bf16.gmra.mxu1 %vm290_vm3, %v4087_v36 }
 0x508   :  { %1369 = vmatpush1.bf16.msra.mxu1 %v2751_v55 }
 0x509   :  { %1370 = vmatprep.subr.bf16.mxu1 %v2757_v10 }
 0x50c   :  { %1371 = vmatpush1.bf16.msra.mxu1 %v2763_v61 }
 0x50d   :  { %1372 = vmatprep.subr.bf16.mxu1 %v2769_v11  ;;  %v4095_v11 = vld [vmem:[#allocation11_spill] sm:$0xff] }
 0x510   :  { %1373 = vmatpush2.bf16.msra.mxu1 %v2775_v12 }
 0x511   :  { %1374 = vmatprep.subr.bf16.mxu1 %v2781_v51 }
 0x514   :  { %1375 = vmatpush2.bf16.msra.mxu1 %v2787_v13  ;;  %v4094_v13 = vld [vmem:[#allocation12_spill] sm:$0xff] }
 0x515   :  { %1376 = vmatprep.subr.bf16.mxu1 %v2793_v0 }
 0x518   :  { %1377 = vmatpush2.bf16.msra.mxu1 %v2799_v56  ;;  %v4093_v56 = vld [vmem:[#allocation13_spill] sm:$0xff] }
 0x519   :  { %1378 = vmatprep.subr.bf16.mxu1 %v2805_v14 }
 0x51c   :  { %1379 = vmatpush2.bf16.msra.mxu1 %v2811_v47  ;;  %v4092_v47 = vld [vmem:[#allocation9_spill] sm:$0xff] }
 0x51d   :  { %1380 = vmatprep.subr.bf16.mxu1 %v2817_v58 }
 0x520   :  { %1381 = vmatpush2.bf16.msra.mxu1 %v2823_v19 }
 0x521   :  { %1382 = vmatprep.subr.bf16.mxu1 %v2829_v52  ;;  %v4091_v52 = vld [vmem:[#allocation8_spill] sm:$0xff] }
 0x524   :  { %1383 = vmatpush2.bf16.msra.mxu1 %v4081_v37 }
 0x525   :  { %1384 = vmatprep.subr.bf16.mxu1 %v4082_v43  ;;  %v4090_v43 = vld [vmem:[#allocation10_spill] sm:$0xff] }
 0x528   :  { %1385 = vmatpush2.bf16.msra.mxu1 %v4083_v17 }
 0x529   :  { %1386 = vmatprep.subr.bf16.mxu1 %v3071_v21 }
 0x52c   :  { %1387 = vmatpush2.bf16.msra.mxu1 %v3076_v20  ;;  %v4089_v20 = vld [vmem:[#allocation7_spill] sm:$0xff] }
 0x52d   :  { %1526 = vmatprep.subr.bf16.mxu1 %v2861_v34 }
 0x5af   :  { %v1165_v39 = vpop.f32.mrf.mxu1 }
 0x5b1   :  { %v1167_v40 = vpop.f32.mrf.mxu1 }
 0x5b3   :  { %v1169_v57 = vpop.f32.mrf.mxu1 }
 0x5b5   :  { %v1171_v54 = vpop.f32.mrf.mxu1 }
 0x5b7   :  { %v1175_v22 = vpop.f32.mrf.mxu1 }
 0x5b9   :  { %v1177_v31 = vpop.f32.mrf.mxu1 }
 0x5bb   :  { %v1179_v25 = vpop.f32.mrf.mxu1 }
 0x5bd   :  { %v1181_v15 = vpop.f32.mrf.mxu1 }
 0x5be   :  { %v1182_v61 = vadd.f32 %v1181_v15, %v4095_v11  ;;  %v4100_v15 = vld [vmem:[#allocation18_spill] sm:$0xff] }
 0x5bf   :  { %v1185_v23 = vpop.f32.mrf.mxu1 }
 0x5c1   :  { %v1187_v42 = vpop.f32.mrf.mxu1 }
 0x5c2   :  { %v1188_v14 = vadd.f32 %v1187_v42, %v4092_v47 }
 0x5c3   :  { %v1189_v24 = vpop.f32.mrf.mxu1 }
 0x5c4   :  { %v1190_v51 = vadd.f32 %v1189_v24, %v4094_v13  ;;  %v1211_v24 = vmax.f32 %v1182_v61, 0.0 }
 0x5c5   :  { %v1191_v48 = vpop.f32.mrf.mxu1 }
 0x5c6   :  { %v1192_v21 = vadd.f32 %v1191_v48, %v4088_v38  ;;  %v4096_v48 = vld [vmem:[#allocation14_spill] sm:$0xff]  ;;  %v1214_v42 = vmax.f32 %v1190_v51, 0.0 }
 0x5c7   :  { %v1195_v36 = vpop.f32.mrf.mxu1  ;;  %v1186_v38 = vadd.f32 %v1185_v23, %v4096_v48 }
 0x5c8   :  { %v1196_v19 = vadd.f32 %v1195_v36, %v4091_v52  ;;  %v1215_v10 = vmax.f32 %v1192_v21, 0.0  ;;  %v4098_v52 = vld [vmem:[#allocation17_spill] sm:$0xff]  ;;  %v1176_v21 = vadd.f32 %v1175_v22, %v4100_v15  ;;  %v4104_v22 = vld [vmem:[#allocation22_spill] sm:$0xff] }
 0x5c9   :  { %v1197_v7 = vpop.f32.mrf.mxu1  ;;  %v1180_v4 = vadd.f32 %v1179_v25, %v4098_v52 }
 0x5ca   :  { %v1198_v17 = vadd.f32 %v1197_v7, %v4089_v20  ;;  %v1216_v7 = vmax.f32 %v1196_v19, 0.0  ;;  %v4097_v20 = vld [vmem:[#allocation15_spill] sm:$0xff] }
 0x5cb   :  { %v1199_v33 = vpop.f32.mrf.mxu1 }
 0x5cc   :  { %v1200_v37 = vadd.f32 %v1199_v33, %v4090_v43  ;;  %v1217_v55 = vmax.f32 %v1198_v17, 0.0  ;;  %v1178_v33 = vadd.f32 %v1177_v31, %v4097_v20  ;;  %v1213_v43 = vmax.f32 %v1188_v14, 0.0  ;;  %v4102_v31 = vld [vmem:[#allocation20_spill] sm:$0xff] }
 0x5cd   :  { %v1201_v58 = vpop.f32.mrf.mxu1  ;;  %v1212_v17 = vmax.f32 %v1186_v38, 0.0  ;;  %v1170_v14 = vadd.f32 %v1169_v57, %v4102_v31 }
 0x5ce   :  { %v1202_v0 = vadd.f32 %v1201_v58, %v4093_v56  ;;  %v1218_v12 = vmax.f32 %v1200_v37, 0.0  ;;  %v4099_v58 = vld [vmem:[#allocation16_spill] sm:$0xff]  ;;  %v1225_v37 = vpack.c.bf16 %v1215_v10, %v1213_v43  ;;  %v1209_v19 = vmax.f32 %v1178_v33, 0.0 }
 0x5cf   :  { %v1172_v56 = vadd.f32 %v1171_v54, %v4099_v58  ;;  %v1208_v54 = vmax.f32 %v1176_v21, 0.0  ;;  %v1206_v61 = vmax.f32 %v1170_v14, 0.0  ;;  %v4111_v14 = vld [vmem:[#allocation48_spill] sm:$0xff] }
 0x5d0   :  { %v1219_v49 = vmax.f32 %v1202_v0, 0.0  ;;  %v1226_v47 = vpack.c.bf16 %v1218_v12, %v1216_v7  ;;  %v4101_v0 = vld [vmem:[#allocation19_spill] sm:$0xff]  ;;  %v1223_v51 = vpack.c.bf16 %v1211_v24, %v1209_v19  ;;  %v4103_v12 = vld [vmem:[#allocation21_spill] sm:$0xff] }
 0x5d1   :  { %v1168_v23 = vadd.f32 %v1167_v40, %v4101_v0  ;;  %v1207_v25 = vmax.f32 %v1172_v56, 0.0  ;;  %v1166_v7 = vadd.f32 %v1165_v39, %v4103_v12  ;;  %v4105_v56 = vld [vmem:[#allocation41_spill] sm:$0xff]  ;;  %v4110_v19 = vld [vmem:[#allocation47_spill] sm:$0xff] }
 0x5d2   :  { %v1227_v36 = vpack.c.bf16 %v1219_v49, %v1217_v55  ;;  %v1210_v49 = vmax.f32 %v1180_v4, 0.0  ;;  %v1224_v55 = vpack.c.bf16 %v1214_v42, %v1212_v17 }
 0x5d3   :  { %v1205_v10 = vmax.f32 %v1168_v23, 0.0  ;;  %v4109_v23 = vld [vmem:[#allocation46_spill] sm:$0xff] }
 0x5d4   :  { %1236 = vmatprep.subr.bf16.mxu0 %v1227_v36  ;;  %v1222_v43 = vpack.c.bf16 %v1210_v49, %v1208_v54  ;;  %v4112_v49 = vld [vmem:[#allocation49_spill] sm:$0xff]  ;;  %v4117_v54 = vld [vmem:[#allocation54_spill] sm:$0xff] }
 0x5d5   :  { %1237 = vmatpush1.bf16.msra.mxu0 %v1226_v47  ;;  %v1221_v38 = vpack.c.bf16 %v1207_v25, %v1205_v10  ;;  %v1204_v47 = vmax.f32 %v1166_v7, 0.0  ;;  %v4114_v25 = vld [vmem:[#allocation51_spill] sm:$0xff]  ;;  %v4116_v7 = vld [vmem:[#allocation53_spill] sm:$0xff] }
 0x5d6   :  { %1238 = vmatprep.subr.bf16.mxu0 %v1225_v37  ;;  %v4118_v10 = vld [vmem:[#allocation55_spill] sm:$0xff] }
 0x5d7   :  { %v1220_v40 = vpack.c.bf16 %v1206_v61, %v1204_v47  ;;  %v4119_v61 = vld [vmem:[#allocation56_spill] sm:$0xff]  ;;  %v4122_v47 = vld [vmem:[#allocation59_spill] sm:$0xff] }
 0x5d9   :  { %1239 = vmatpush1.bf16.msra.mxu0 %v1224_v55  ;;  %v4113_v55 = vld [vmem:[#allocation50_spill] sm:$0xff] }
 0x5da   :  { %1240 = vmatprep.subr.bf16.mxu0 %v1223_v51  ;;  %v4115_v51 = vld [vmem:[#allocation52_spill] sm:$0xff] }
 0x5dd   :  { %1241 = vmatpush1.bf16.msra.mxu0 %v1222_v43  ;;  %v4120_v43 = vld [vmem:[#allocation57_spill] sm:$0xff] }
 0x5de   :  { %1242 = vmatprep.subr.bf16.mxu0 %v1221_v38  ;;  %v4121_v38 = vld [vmem:[#allocation58_spill] sm:$0xff] }
 0x5e1   :  { %1243 = vmatpush1.bf16.msra.mxu0 %v1220_v40 }
 0x5e4   :  { %2201 = vmatmul.mubr.msk.bf16.vlgmr.msra.gmra.mxu0 %vm412_vm4, %v4104_v22 }
 0x5e5   :  { %1345 = vmatprep.mubr.f32.mxu0 %v4077_v18 }
 0x6a4   :  { %v1262_v4 = vpop.f32.mrf.mxu0 }
 0x6a5   :  { %v1263_v39 = vadd.f32 %v1262_v4, %v4105_v56 }
 0x6a6   :  { %v1264_v57 = vpop.f32.mrf.mxu0 }
 0x6a7   :  { %v1265_v33 = vadd.f32 %v1264_v57, %v4105_v56  ;;  %v1269_v42 = vadd.f32 %v1263_v39, %v3165_v27  ;;  %v4108_v27 = vld [vmem:[#allocation45_spill] sm:$0xff] }
 0x6a8   :  { %v1266_v36 = vpop.f32.mrf.mxu0 }
 0x6a9   :  { %v1270_v24 = vadd.f32 %v1265_v33, %v3169_v41  ;;  %v4106_v41 = vld [vmem:[#allocation43_spill] sm:$0xff]  ;;  %v1352_v40 = vpack.c.bf16 %v1269_v42, %v1269_v42 }
 0x6aa   :  { %v1267_v37 = vpop.f32.mrf.mxu0 }
 0x6ab   :  { %v1273_v21 = vcombine.low %v1269_v42, %v1270_v24  ;;  %2203 = vmatprep.subr.msk.mxu0 %vm204_vm0, %v1270_v24  ;;  %v1353_v17 = vpack.c.bf16 %v1270_v24, %v1270_v24 }
 0x6ac   :  { %2204 = vmatpush1.msk.msra.mxu0 %vm204_vm0, %v1269_v42 }
 0x6ad   :  { %2202 = vst [vmem:[%s3883_s13 + $0x10] sm:$0xff] %v1273_v21  ;;  %2205 = vmatmul.mubr.msk.f32.vlgmr.msra.gmra.mxu0 %vm290_vm3, %v2867_v44  ;;  %1397 = vmatprep.subr.bf16.mxu0 %v2861_v34  ;;  %v4107_v34 = vld [vmem:[#allocation44_spill] sm:$0xff] }
 0x6ae   :  { %1398 = vmatpush1.bf16.msra.mxu0 %v2872_v2  ;;  %1429 = vmatprep.mubr.bf16.mxu0 %v1353_v17  ;;  %v3325_v21 = vld [vmem:[%s3881_s11 + $0x74] ss:$8 sps:$4 sm:$0xff]   ;;  %v3331_v17 = vld [vmem:[%s3881_s11 + $0x70] ss:$8 sps:$4 sm:$0xff]  }
 0x6af   :  { %1399 = vmatprep.subr.bf16.mxu0 %v2879_v29 }
 0x6b2   :  { %1400 = vmatpush1.bf16.msra.mxu0 %v2893_v3 }
 0x6b3   :  { %1401 = vmatprep.subr.bf16.mxu0 %v2899_v30 }
 0x6b6   :  { %1402 = vmatpush1.bf16.msra.mxu0 %v2905_v32 }
 0x6b7   :  { %1403 = vmatprep.subr.bf16.mxu0 %v2911_v50 }
 0x6ba   :  { %1404 = vmatpush1.bf16.msra.mxu0 %v2917_v6 }
 0x6bb   :  { %1405 = vmatprep.subr.bf16.mxu0 %v2923_v28 }
 0x6be   :  { %1406 = vmatpush1.bf16.msra.mxu0 %v2929_v46 }
 0x6bf   :  { %1407 = vmatprep.subr.bf16.mxu0 %v2935_v26 }
 0x6c2   :  { %1408 = vmatpush1.bf16.msra.mxu0 %v2941_v35 }
 0x6c3   :  { %1409 = vmatprep.subr.bf16.mxu0 %v2947_v45 }
 0x6c6   :  { %1410 = vmatpush1.bf16.msra.mxu0 %v2953_v8 }
 0x6c7   :  { %1411 = vmatprep.subr.bf16.mxu0 %v2959_v9 }
 0x6ca   :  { %1412 = vmatpush1.bf16.msra.mxu0 %v4106_v41 }
 0x6cb   :  { %1413 = vmatprep.subr.bf16.mxu0 %v4107_v34 }
 0x6ce   :  { %1414 = vmatpush2.bf16.msra.mxu0 %v4108_v27 }
 0x6cf   :  { %1415 = vmatprep.subr.bf16.mxu0 %v4109_v23 }
 0x6d2   :  { %1416 = vmatpush2.bf16.msra.mxu0 %v4110_v19 }
 0x6d3   :  { %1417 = vmatprep.subr.bf16.mxu0 %v4111_v14 }
 0x6d6   :  { %1418 = vmatpush2.bf16.msra.mxu0 %v4112_v49 }
 0x6d7   :  { %1419 = vmatprep.subr.bf16.mxu0 %v4113_v55 }
 0x6da   :  { %1420 = vmatpush2.bf16.msra.mxu0 %v4114_v25 }
 0x6db   :  { %1421 = vmatprep.subr.bf16.mxu0 %v4115_v51 }
 0x6de   :  { %1422 = vmatpush2.bf16.msra.mxu0 %v4116_v7 }
 0x6df   :  { %1423 = vmatprep.subr.bf16.mxu0 %v4117_v54 }
 0x6e2   :  { %1424 = vmatpush2.bf16.msra.mxu0 %v4118_v10 }
 0x6e3   :  { %1425 = vmatprep.subr.bf16.mxu0 %v4119_v61 }
 0x6e6   :  { %1426 = vmatpush2.bf16.msra.mxu0 %v4120_v43 }
 0x6e7   :  { %1427 = vmatprep.subr.bf16.mxu0 %v4121_v38 }
 0x6ea   :  { %1428 = vmatpush2.bf16.msra.mxu0 %v4122_v47 }
 0x6ed   :  { %1430 = vmatmul.mubr.bf16.vlgmr.msra.gmra.mxu0 %v1352_v40 }
 0x6ee   :  { %1516 = vmatprep.mubr.f32.mxu0 %v4077_v18 }
 0x76d   :  { %v1347_v4 = vpop.f32.mrf.mxu0 }
 0x76e   :  { %v1354_v33 = vpack.c.bf16 %v1347_v4, %v1347_v4 }
 0x76f   :  { %v1349_v39 = vpop.f32.mrf.mxu0 }
 0x770   :  { %v1355_v57 = vpack.c.bf16 %v1349_v39, %v1349_v39 }
 0x772   :  { %1388 = vmatprep.mubr.bf16.mxu1 %v1355_v57 }
 0x773   :  { %1389 = vmatmul.mubr.bf16.vlgmr.msra.gmra.mxu1 %v1354_v33 }
 0x774   :  { %1527 = vmatpush1.bf16.msra.mxu1 %v2872_v2 }
 0x775   :  { %1528 = vmatprep.subr.bf16.mxu1 %v2879_v29 }
 0x778   :  { %1529 = vmatpush1.bf16.msra.mxu1 %v2893_v3 }
 0x779   :  { %1530 = vmatprep.subr.bf16.mxu1 %v2899_v30 }
 0x77c   :  { %1531 = vmatpush1.bf16.msra.mxu1 %v2905_v32 }
 0x77d   :  { %1532 = vmatprep.subr.bf16.mxu1 %v2911_v50  ;;  %v4123_v50 = vld [vmem:[#allocation62_spill] sm:$0xff] }
 0x780   :  { %1533 = vmatpush1.bf16.msra.mxu1 %v2917_v6 }
 0x781   :  { %1534 = vmatprep.subr.bf16.mxu1 %v2923_v28  ;;  %v4124_v28 = vld [vmem:[#allocation63_spill] sm:$0xff] }
 0x784   :  { %1535 = vmatpush1.bf16.msra.mxu1 %v2929_v46 }
 0x785   :  { %1536 = vmatprep.subr.bf16.mxu1 %v2935_v26 }
 0x788   :  { %1537 = vmatpush1.bf16.msra.mxu1 %v2941_v35 }
 0x789   :  { %1538 = vmatprep.subr.bf16.mxu1 %v2947_v45 }
 0x78c   :  { %1539 = vmatpush1.bf16.msra.mxu1 %v2953_v8 }
 0x78d   :  { %1540 = vmatprep.subr.bf16.mxu1 %v2959_v9 }
 0x790   :  { %1541 = vmatpush1.bf16.msra.mxu1 %v4106_v41  ;;  %v3344_v41 = vld [vmem:[%s3881_s11 + $0x60] ss:$8 sps:$4 sm:$0xff]  }
 0x791   :  { %1542 = vmatprep.subr.bf16.mxu1 %v4107_v34  ;;  %v4125_v34 = vld [vmem:[#allocation23_spill] sm:$0xff] }
 0x794   :  { %1543 = vmatpush2.bf16.msra.mxu1 %v4108_v27  ;;  %v4126_v27 = vld [vmem:[#allocation24_spill] sm:$0xff] }
 0x795   :  { %1544 = vmatprep.subr.bf16.mxu1 %v4109_v23  ;;  %v4127_v23 = vld [vmem:[#allocation25_spill] sm:$0xff] }
 0x798   :  { %1545 = vmatpush2.bf16.msra.mxu1 %v4110_v19  ;;  %v4128_v19 = vld [vmem:[#allocation26_spill] sm:$0xff] }
 0x799   :  { %1546 = vmatprep.subr.bf16.mxu1 %v4111_v14  ;;  %v4136_v14 = vld [vmem:[#allocation34_spill] sm:$0xff] }
 0x79c   :  { %1547 = vmatpush2.bf16.msra.mxu1 %v4112_v49  ;;  %v4137_v49 = vld [vmem:[#allocation35_spill] sm:$0xff] }
 0x79d   :  { %1548 = vmatprep.subr.bf16.mxu1 %v4113_v55  ;;  %v4138_v55 = vld [vmem:[#allocation36_spill] sm:$0xff] }
 0x7a0   :  { %1549 = vmatpush2.bf16.msra.mxu1 %v4114_v25  ;;  %v4139_v25 = vld [vmem:[#allocation37_spill] sm:$0xff] }
 0x7a1   :  { %1550 = vmatprep.subr.bf16.mxu1 %v4115_v51  ;;  %v4140_v51 = vld [vmem:[#allocation38_spill] sm:$0xff] }
 0x7a4   :  { %1551 = vmatpush2.bf16.msra.mxu1 %v4116_v7  ;;  %v4141_v7 = vld [vmem:[#allocation39_spill] sm:$0xff] }
 0x7a5   :  { %1552 = vmatprep.subr.bf16.mxu1 %v4117_v54  ;;  %v4142_v54 = vld [vmem:[#allocation40_spill] sm:$0xff] }
 0x7a8   :  { %1553 = vmatpush2.bf16.msra.mxu1 %v4118_v10  ;;  %v4143_v10 = vld [vmem:[#allocation42_spill] sm:$0xff] }
 0x7a9   :  { %1554 = vmatprep.subr.bf16.mxu1 %v4119_v61  ;;  %v4144_v61 = vld [vmem:[#allocation60_spill] sm:$0xff] }
 0x7ac   :  { %1555 = vmatpush2.bf16.msra.mxu1 %v4120_v43  ;;  %v4145_v43 = vld [vmem:[#allocation61_spill] sm:$0xff] }
 0x7ad   :  { %v1431_v9 = vpop.f32.mrf.mxu0  ;;  %1556 = vmatprep.subr.bf16.mxu1 %v4121_v38 }
 0x7af   :  { %v1433_v8 = vpop.f32.mrf.mxu0 }
 0x7b0   :  { %1557 = vmatpush2.bf16.msra.mxu1 %v4122_v47 }
 0x7b1   :  { %v1435_v45 = vpop.f32.mrf.mxu0 }
 0x7b3   :  { %v1436_v35 = vpop.f32.mrf.mxu0 }
 0x833   :  { %v1390_v46 = vpop.f32.mrf.mxu1 }
 0x834   :  { %v1432_v2 = vadd.f32 %v1431_v9, %v1390_v46 }
 0x835   :  { %v1392_v26 = vpop.f32.mrf.mxu1 }
 0x836   :  { %v1434_v29 = vadd.f32 %v1433_v8, %v1392_v26 }
 0x837   :  { %v1394_v3 = vpop.f32.mrf.mxu1 }
 0x838   :  { %v1440_v30 = vcombine.low %v1432_v2, %v1434_v29 }
 0x839   :  { %v1395_v32 = vpop.f32.mrf.mxu1 }
 0x83a   :  { %v1442_v6 = vmul.f32 %v1440_v30, %v4123_v50  ;;  %v4146_v32 = vld [vmem:[#allocation2_spill] sm:$0xff] }
 0x83c   :  { %v1443_v36 = vadd.f32 %v1442_v6, %v4124_v28  ;;  %v3396_v6 = vld [vmem:[%s3881_s11 + $0x54] ss:$8 sps:$4 sm:$0xff]   ;;  %v4165_v28 = vld [vmem:[#allocation6_spill] sm:$0xff] }
 0x83e   :  { %2206 = vst [vmem:[%s3883_s13 + $0x18] sm:$0xff] %v1443_v36  ;;  %v1447_v42 = vcombine.high %v1443_v36, %v1443_v36  ;;  %v1524_v37 = vpack.c.bf16 %v1443_v36, %v1443_v36 }
 0x840   :  { %2207 = vmatprep.subr.msk.mxu0 %vm204_vm0, %v1447_v42  ;;  %v1525_v24 = vpack.c.bf16 %v1447_v42, %v1447_v42  ;;  %v3405_v42 = vld [vmem:[%s3881_s11 + $0x50] ss:$8 sps:$4 sm:$0xff]  }
 0x841   :  { %2208 = vmatpush1.msk.msra.mxu0 %vm204_vm0, %v1443_v36  ;;  %v4147_v36 = vld [vmem:[#allocation3_spill] sm:$0xff] }
 0x842   :  { %2209 = vmatmul.mubr.msk.f32.vlgmr.msra.gmra.mxu0 %vm290_vm3, %v2867_v44  ;;  %1558 = vmatprep.mubr.bf16.mxu1 %v1525_v24  ;;  %v3338_v44 = vld [vmem:[%s3881_s11 + $0x64] ss:$8 sps:$4 sm:$0xff]  }
 0x843   :  { %1559 = vmatmul.mubr.bf16.vlgmr.msra.gmra.mxu1 %v1524_v37  ;;  %1569 = vmatprep.subr.bf16.mxu0 %v3325_v21  ;;  %v3411_v24 = vld [vmem:[%s3881_s11 + $0x44] ss:$8 sps:$4 sm:$0xff]   ;;  %v3417_v37 = vld [vmem:[%s3881_s11 + $0x40] ss:$8 sps:$4 sm:$0xff]  }
 0x844   :  { %1570 = vmatpush1.bf16.msra.mxu0 %v3331_v17  ;;  %1652 = vmatprep.mubr.bf16.mxu1 %v4080_v16 }
 0x845   :  { %1571 = vmatprep.subr.bf16.mxu0 %v3338_v44 }
 0x848   :  { %1572 = vmatpush1.bf16.msra.mxu0 %v3344_v41 }
 0x849   :  { %1573 = vmatprep.subr.bf16.mxu0 %v2697_v62  ;;  %v4129_v62 = vld [vmem:[#allocation27_spill] sm:$0xff] }
 0x84c   :  { %1574 = vmatpush1.bf16.msra.mxu0 %v2703_v59  ;;  %v4130_v59 = vld [vmem:[#allocation28_spill] sm:$0xff] }
 0x84d   :  { %1575 = vmatprep.subr.bf16.mxu0 %v2709_v60  ;;  %v4131_v60 = vld [vmem:[#allocation29_spill] sm:$0xff] }
 0x850   :  { %1576 = vmatpush1.bf16.msra.mxu0 %v2715_v63  ;;  %v4132_v63 = vld [vmem:[#allocation30_spill] sm:$0xff] }
 0x851   :  { %1577 = vmatprep.subr.bf16.mxu0 %v2721_v1  ;;  %v4133_v1 = vld [vmem:[#allocation31_spill] sm:$0xff] }
 0x854   :  { %1578 = vmatpush1.bf16.msra.mxu0 %v2727_v5  ;;  %v4134_v5 = vld [vmem:[#allocation32_spill] sm:$0xff] }
 0x855   :  { %1579 = vmatprep.subr.bf16.mxu0 %v2733_v53  ;;  %v4135_v53 = vld [vmem:[#allocation33_spill] sm:$0xff] }
 0x858   :  { %1580 = vmatpush1.bf16.msra.mxu0 %v4125_v34  ;;  %v3423_v34 = vld [vmem:[%s3881_s11 + $0x34] ss:$8 sps:$4 sm:$0xff]  }
 0x859   :  { %1581 = vmatprep.subr.bf16.mxu0 %v4126_v27  ;;  %v4148_v27 = vld [vmem:[#allocation4_spill] sm:$0xff] }
 0x85c   :  { %1582 = vmatpush1.bf16.msra.mxu0 %v4127_v23  ;;  %v3432_v23 = vld [vmem:[%s3881_s11 + $0x30] ss:$8 sps:$4 sm:$0xff]  }
 0x85d   :  { %1583 = vmatprep.subr.bf16.mxu0 %v4128_v19  ;;  %v3438_v19 = vld [vmem:[%s3881_s11 + $0x24] ss:$8 sps:$4 sm:$0xff]  }
 0x860   :  { %1584 = vmatpush1.bf16.msra.mxu0 %v4129_v62  ;;  %v3444_v62 = vld [vmem:[%s3881_s11 + $0x20] ss:$8 sps:$4 sm:$0xff]  }
 0x861   :  { %1585 = vmatprep.subr.bf16.mxu0 %v4130_v59  ;;  %v4149_v59 = vld [vmem:[#allocation5_spill] sm:$0xff] }
 0x864   :  { %1586 = vmatpush2.bf16.msra.mxu0 %v4131_v60  ;;  %v3458_v60 = vld [vmem:[%s3881_s11 + $0x10] ss:$8 sps:$4 sm:$0xff]  }
 0x865   :  { %1587 = vmatprep.subr.bf16.mxu0 %v4132_v63  ;;  %v3464_v63 = vld [vmem:[%s3881_s11 + $0x4] ss:$8 sps:$4 sm:$0xff]  }
 0x868   :  { %1588 = vmatpush2.bf16.msra.mxu0 %v4133_v1  ;;  %v3470_v1 = vld [vmem:[%s3881_s11] ss:$8 sps:$4 sm:$0xff]  }
 0x869   :  { %1589 = vmatprep.subr.bf16.mxu0 %v4134_v5  ;;  %4150 = vst [vmem:[#allocation12_spill] sm:$0xff] %v3470_v1  ;;  %v3476_v5 = vld [vmem:[%s3881_s11 + $0xf4] ss:$8 sps:$4 sm:$0xff]  }
 0x86a   :  { %4151 = vst [vmem:[#allocation11_spill] sm:$0xff] %v3476_v5 }
 0x86c   :  { %1590 = vmatpush2.bf16.msra.mxu0 %v4135_v53  ;;  %v3482_v53 = vld [vmem:[%s3881_s11 + $0xf0] ss:$8 sps:$4 sm:$0xff]  }
 0x86d   :  { %1591 = vmatprep.subr.bf16.mxu0 %v4136_v14  ;;  %4152 = vst [vmem:[#allocation14_spill] sm:$0xff] %v3482_v53  ;;  %v3488_v14 = vld [vmem:[%s3881_s11 + $0xe4] ss:$8 sps:$4 sm:$0xff]  }
 0x86e   :  { %4153 = vst [vmem:[#allocation15_spill] sm:$0xff] %v3488_v14 }
 0x870   :  { %1592 = vmatpush2.bf16.msra.mxu0 %v4137_v49  ;;  %v3494_v49 = vld [vmem:[%s3881_s11 + $0xe0] ss:$8 sps:$4 sm:$0xff]  }
 0x871   :  { %1593 = vmatprep.subr.bf16.mxu0 %v4138_v55  ;;  %4154 = vst [vmem:[#allocation17_spill] sm:$0xff] %v3494_v49  ;;  %v3500_v55 = vld [vmem:[%s3881_s11 + $0xd4] ss:$8 sps:$4 sm:$0xff]  }
 0x872   :  { %4155 = vst [vmem:[#allocation16_spill] sm:$0xff] %v3500_v55 }
 0x874   :  { %1594 = vmatpush2.bf16.msra.mxu0 %v4139_v25  ;;  %v3506_v25 = vld [vmem:[%s3881_s11 + $0xd0] ss:$8 sps:$4 sm:$0xff]  }
 0x875   :  { %1595 = vmatprep.subr.bf16.mxu0 %v4140_v51  ;;  %4156 = vst [vmem:[#allocation18_spill] sm:$0xff] %v3506_v25  ;;  %v3512_v51 = vld [vmem:[%s3881_s11 + $0xc4] ss:$8 sps:$4 sm:$0xff]  }
 0x876   :  { %4157 = vst [vmem:[#allocation19_spill] sm:$0xff] %v3512_v51 }
 0x878   :  { %1596 = vmatpush2.bf16.msra.mxu0 %v4141_v7  ;;  %v3518_v7 = vld [vmem:[%s3881_s11 + $0xc0] ss:$8 sps:$4 sm:$0xff]  }
 0x879   :  { %1597 = vmatprep.subr.bf16.mxu0 %v4142_v54  ;;  %4158 = vst [vmem:[#allocation20_spill] sm:$0xff] %v3518_v7  ;;  %v3524_v54 = vld [vmem:[%s3881_s11 + $0xb4] ss:$8 sps:$4 sm:$0xff]  }
 0x87a   :  { %4159 = vst [vmem:[#allocation21_spill] sm:$0xff] %v3524_v54 }
 0x87c   :  { %1598 = vmatpush2.bf16.msra.mxu0 %v4143_v10  ;;  %v3530_v10 = vld [vmem:[%s3881_s11 + $0xb0] ss:$8 sps:$4 sm:$0xff]  }
 0x87d   :  { %1599 = vmatprep.subr.bf16.mxu0 %v4144_v61  ;;  %4160 = vst [vmem:[#allocation22_spill] sm:$0xff] %v3530_v10 }
 0x880   :  { %1600 = vmatpush2.bf16.msra.mxu0 %v4145_v43 }
 0x902   :  { %v1518_v38 = vpop.f32.mrf.mxu0 }
 0x903   :  { %v1560_v47 = vpop.f32.mrf.mxu1  ;;  %v1567_v57 = vpack.c.bf16 %v1518_v38, %v1518_v38  ;;  %v3536_v38 = vld [vmem:[%s3881_s11 + $0xa4] ss:$8 sps:$4 sm:$0xff]  }
 0x904   :  { %v1520_v40 = vpop.f32.mrf.mxu0  ;;  %4161 = vst [vmem:[#allocation41_spill] sm:$0xff] %v3536_v38 }
 0x905   :  { %v1568_v4 = vpack.c.bf16 %v1520_v40, %v1520_v40  ;;  %v1562_v39 = vpop.f32.mrf.mxu1  ;;  %v3548_v40 = vld [vmem:[%s3881_s11 + $0x94] ss:$8 sps:$4 sm:$0xff]  }
 0x906   :  { %4163 = vst [vmem:[#allocation44_spill] sm:$0xff] %v3548_v40 }
 0x907   :  { %v1564_v33 = vpop.f32.mrf.mxu1  ;;  %1601 = vmatprep.mubr.bf16.mxu0 %v1568_v4  ;;  %v3554_v4 = vld [vmem:[%s3881_s11 + $0x90] ss:$8 sps:$4 sm:$0xff]  }
 0x908   :  { %1602 = vmatmul.mubr.bf16.vlgmr.msra.gmra.mxu0 %v1567_v57  ;;  %4164 = vst [vmem:[#allocation45_spill] sm:$0xff] %v3554_v4 }
 0x909   :  { %v1565_v9 = vpop.f32.mrf.mxu1  ;;  %1749 = vmatprep.mubr.bf16.mxu0 %v4080_v16 }
 0x9c8   :  { %v1603_v8 = vpop.f32.mrf.mxu0 }
 0x9c9   :  { %v3376_v45 = vsub.f32 %v1560_v47, %v1603_v8  ;;  %v3542_v47 = vld [vmem:[%s3881_s11 + $0xa0] ss:$8 sps:$4 sm:$0xff]  }
 0x9ca   :  { %v1605_v35 = vpop.f32.mrf.mxu0  ;;  %4162 = vst [vmem:[#allocation43_spill] sm:$0xff] %v3542_v47 }
 0x9cb   :  { %v1612_v46 = vpack.c.bf16 %v3376_v45, %v3376_v45  ;;  %v3380_v26 = vsub.f32 %v1562_v39, %v1605_v35 }
 0x9cc   :  { %v1607_v2 = vpop.f32.mrf.mxu0 }
 0x9cd   :  { %v1613_v29 = vpack.c.bf16 %v3380_v26, %v3380_v26  ;;  %v1615_v30 = vsel %vm303_vm1, %v1612_v46, 0 }
 0x9ce   :  { %v1608_v3 = vpop.f32.mrf.mxu0 }
 0x9cf   :  { %2210 = vmatprep.subr.msk.bf16.mxu1 %vm303_vm1, %v1613_v29 }
 0x9d0   :  { %1635 = vmatpush1.bf16.msra.mxu1 %v1615_v30 }
 0x9d1   :  { %1845 = vmatprep.subr.bf16.mxu1 %v3325_v21 }
 0x9d3   :  { %2211 = vmatmul.mubr.msk.bf16.vlgmr.msra.gmra.mxu1 %vm290_vm3, %v4146_v32 }
 0x9d4   :  { %1662 = vmatprep.mubr.bf16.mxu1 %v4080_v16  ;;  %1846 = vmatpush1.bf16.msra.mxu1 %v3331_v17 }
 0x9d5   :  { %1847 = vmatprep.subr.bf16.mxu1 %v3338_v44 }
 0x9d8   :  { %1848 = vmatpush1.bf16.msra.mxu1 %v3344_v41 }
 0x9d9   :  { %1849 = vmatprep.subr.bf16.mxu1 %v3396_v6 }
 0x9db   :  { %2212 = vmatmul.mubr.msk.bf16.gmra.mxu1 %vm290_vm3, %v4147_v36 }
 0x9dc   :  { %1672 = vmatprep.mubr.bf16.mxu1 %v4080_v16  ;;  %1850 = vmatpush1.bf16.msra.mxu1 %v3405_v42 }
 0x9dd   :  { %1851 = vmatprep.subr.bf16.mxu1 %v3411_v24 }
 0x9e0   :  { %1852 = vmatpush1.bf16.msra.mxu1 %v3417_v37 }
 0x9e1   :  { %1853 = vmatprep.subr.bf16.mxu1 %v3423_v34 }
 0x9e3   :  { %2213 = vmatmul.mubr.msk.bf16.gmra.mxu1 %vm290_vm3, %v4148_v27 }
 0x9e4   :  { %1682 = vmatprep.mubr.bf16.mxu1 %v4080_v16  ;;  %1854 = vmatpush1.bf16.msra.mxu1 %v3432_v23  ;;  %v3450_v16 = vld [vmem:[%s3881_s11 + $0x14] ss:$8 sps:$4 sm:$0xff]  }
 0x9e5   :  { %1855 = vmatprep.subr.bf16.mxu1 %v3438_v19 }
 0x9e8   :  { %1856 = vmatpush1.bf16.msra.mxu1 %v3444_v62 }
 0x9e9   :  { %1857 = vmatprep.subr.bf16.mxu1 %v3450_v16 }
 0x9eb   :  { %2214 = vmatmul.mubr.msk.bf16.gmra.mxu1 %vm290_vm3, %v4149_v59 }
 0x9ec   :  { %1858 = vmatpush1.bf16.msra.mxu1 %v3458_v60 }
 0x9ed   :  { %1859 = vmatprep.subr.bf16.mxu1 %v3464_v63 }
 0x9f0   :  { %1860 = vmatpush1.bf16.msra.mxu1 %v3470_v1 }
 0x9f1   :  { %1861 = vmatprep.subr.bf16.mxu1 %v3476_v5 }
 0x9f4   :  { %1862 = vmatpush2.bf16.msra.mxu1 %v3482_v53 }
 0x9f5   :  { %1863 = vmatprep.subr.bf16.mxu1 %v3488_v14 }
 0x9f8   :  { %1864 = vmatpush2.bf16.msra.mxu1 %v3494_v49 }
 0x9f9   :  { %1865 = vmatprep.subr.bf16.mxu1 %v3500_v55 }
 0x9fc   :  { %1866 = vmatpush2.bf16.msra.mxu1 %v3506_v25 }
 0x9fd   :  { %1867 = vmatprep.subr.bf16.mxu1 %v3512_v51  ;;  %v4170_v51 = vld [vmem:[#allocation13_spill] sm:$0xff] }
 0xa00   :  { %1868 = vmatpush2.bf16.msra.mxu1 %v3518_v7 }
 0xa01   :  { %1869 = vmatprep.subr.bf16.mxu1 %v3524_v54  ;;  %v4169_v54 = vld [vmem:[#allocation9_spill] sm:$0xff] }
 0xa04   :  { %1870 = vmatpush2.bf16.msra.mxu1 %v3530_v10 }
 0xa05   :  { %1871 = vmatprep.subr.bf16.mxu1 %v3536_v38 }
 0xa08   :  { %1872 = vmatpush2.bf16.msra.mxu1 %v3542_v47  ;;  %v4168_v47 = vld [vmem:[#allocation8_spill] sm:$0xff] }
 0xa09   :  { %1873 = vmatprep.subr.bf16.mxu1 %v3548_v40 }
 0xa0c   :  { %1874 = vmatpush2.bf16.msra.mxu1 %v3554_v4 }
 0xa0d   :  { %1875 = vmatprep.subr.bf16.mxu1 %v4144_v61  ;;  %v4166_v61 = vld [vmem:[#allocation7_spill] sm:$0xff] }
 0xa10   :  { %1876 = vmatpush2.bf16.msra.mxu1 %v4145_v43  ;;  %v4167_v43 = vld [vmem:[#allocation10_spill] sm:$0xff] }
 0xa93   :  { %v1654_v39 = vpop.f32.mrf.mxu1 }
 0xa95   :  { %v1656_v57 = vpop.f32.mrf.mxu1 }
 0xa97   :  { %v1658_v33 = vpop.f32.mrf.mxu1 }
 0xa99   :  { %v1660_v9 = vpop.f32.mrf.mxu1 }
 0xa9b   :  { %v1664_v8 = vpop.f32.mrf.mxu1 }
 0xa9d   :  { %v1666_v35 = vpop.f32.mrf.mxu1 }
 0xa9f   :  { %v1668_v46 = vpop.f32.mrf.mxu1 }
 0xaa1   :  { %v1670_v2 = vpop.f32.mrf.mxu1 }
 0xaa2   :  { %v1671_v14 = vadd.f32 %v1670_v2, %v4095_v11  ;;  %v1665_v11 = vadd.f32 %v1664_v8, %v4100_v15  ;;  %v3625_v2 = vld [vmem:[%s3880_s10 + $0x54] ss:$8 sps:$4 sm:$0xff]  }
 0xaa3   :  { %v1674_v29 = vpop.f32.mrf.mxu1 }
 0xaa5   :  { %v1676_v3 = vpop.f32.mrf.mxu1 }
 0xaa6   :  { %v1677_v7 = vadd.f32 %v1676_v3, %v4169_v54 }
 0xaa7   :  { %v1678_v30 = vpop.f32.mrf.mxu1 }
 0xaa8   :  { %v1679_v55 = vadd.f32 %v1678_v30, %v4094_v13  ;;  %v1700_v13 = vmax.f32 %v1671_v14, 0.0  ;;  %v3637_v30 = vld [vmem:[%s3880_s10 + $0x44] ss:$8 sps:$4 sm:$0xff]  }
 0xaa9   :  { %v1680_v32 = vpop.f32.mrf.mxu1 }
 0xaaa   :  { %v1681_v50 = vadd.f32 %v1680_v32, %v4165_v28  ;;  %v1675_v28 = vadd.f32 %v1674_v29, %v4096_v48  ;;  %v1703_v54 = vmax.f32 %v1679_v55, 0.0  ;;  %v1657_v48 = vadd.f32 %v1656_v57, %v4101_v0  ;;  %v3631_v29 = vld [vmem:[%s3880_s10 + $0x50] ss:$8 sps:$4 sm:$0xff]  }
 0xaab   :  { %v1684_v36 = vpop.f32.mrf.mxu1 }
 0xaac   :  { %v1685_v38 = vadd.f32 %v1684_v36, %v4168_v47  ;;  %v1704_v53 = vmax.f32 %v1681_v50, 0.0  ;;  %v1669_v36 = vadd.f32 %v1668_v46, %v4098_v52  ;;  %v1701_v50 = vmax.f32 %v1675_v28, 0.0  ;;  %v3619_v46 = vld [vmem:[%s3880_s10 + $0x60] ss:$8 sps:$4 sm:$0xff]   ;;  %v3655_v28 = vld [vmem:[%s3880_s10 + $0x30] ss:$8 sps:$4 sm:$0xff]  }
 0xaad   :  { %v1686_v27 = vpop.f32.mrf.mxu1 }
 0xaae   :  { %v1687_v4 = vadd.f32 %v1686_v27, %v4166_v61  ;;  %v1705_v32 = vmax.f32 %v1685_v38, 0.0  ;;  %v1667_v27 = vadd.f32 %v1666_v35, %v4097_v20  ;;  %v1659_v20 = vadd.f32 %v1658_v33, %v4102_v31  ;;  %v3613_v35 = vld [vmem:[%s3880_s10 + $0x64] ss:$8 sps:$4 sm:$0xff]   ;;  %v3643_v61 = vld [vmem:[%s3880_s10 + $0x40] ss:$8 sps:$4 sm:$0xff]  }
 0xaaf   :  { %v1688_v59 = vpop.f32.mrf.mxu1 }
 0xab0   :  { %v1689_v40 = vadd.f32 %v1688_v59, %v4167_v43  ;;  %v1706_v5 = vmax.f32 %v1687_v4, 0.0  ;;  %v1702_v59 = vmax.f32 %v1677_v7, 0.0  ;;  %v1695_v14 = vmax.f32 %v1659_v20, 0.0  ;;  %v3649_v43 = vld [vmem:[%s3880_s10 + $0x34] ss:$8 sps:$4 sm:$0xff]  }
 0xab1   :  { %v1690_v10 = vpop.f32.mrf.mxu1  ;;  %v3745_v20 = vld [vmem:[%s3880_s10 + $0xb4] ss:$8 sps:$4 sm:$0xff]  }
 0xab2   :  { %v1691_v25 = vadd.f32 %v1690_v10, %v4170_v51  ;;  %v1707_v49 = vmax.f32 %v1689_v40, 0.0  ;;  %v1661_v51 = vadd.f32 %v1660_v9, %v4099_v58  ;;  %v1714_v10 = vpack.c.bf16 %v1704_v53, %v1702_v59  ;;  %v3673_v59 = vld [vmem:[%s3880_s10 + $0x14] ss:$8 sps:$4 sm:$0xff]  }
 0xab3   :  { %v1697_v58 = vmax.f32 %v1665_v11, 0.0  ;;  %v1694_v53 = vmax.f32 %v1657_v48, 0.0  ;;  %v3721_v11 = vld [vmem:[%s3880_s10 + $0xd4] ss:$8 sps:$4 sm:$0xff]   ;;  %v3733_v48 = vld [vmem:[%s3880_s10 + $0xc4] ss:$8 sps:$4 sm:$0xff]  }
 0xab4   :  { %v1708_v1 = vmax.f32 %v1691_v25, 0.0  ;;  %v1715_v3 = vpack.c.bf16 %v1707_v49, %v1705_v32  ;;  %v1698_v25 = vmax.f32 %v1667_v27, 0.0  ;;  %v1696_v52 = vmax.f32 %v1661_v51, 0.0  ;;  %v3661_v32 = vld [vmem:[%s3880_s10 + $0x24] ss:$8 sps:$4 sm:$0xff]  }
 0xab5   :  { %v1655_v49 = vadd.f32 %v1654_v39, %v4103_v12  ;;  %v3667_v27 = vld [vmem:[%s3880_s10 + $0x20] ss:$8 sps:$4 sm:$0xff]   ;;  %v3703_v51 = vld [vmem:[%s3880_s10 + $0xf0] ss:$8 sps:$4 sm:$0xff]  }
 0xab6   :  { %v1716_v47 = vpack.c.bf16 %v1708_v1, %v1706_v5  ;;  %v1699_v1 = vmax.f32 %v1669_v36, 0.0  ;;  %v1713_v5 = vpack.c.bf16 %v1703_v54, %v1701_v50  ;;  %v1712_v55 = vpack.c.bf16 %v1700_v13, %v1698_v25  ;;  %v3685_v36 = vld [vmem:[%s3880_s10 + $0x4] ss:$8 sps:$4 sm:$0xff]   ;;  %v3691_v54 = vld [vmem:[%s3880_s10] ss:$8 sps:$4 sm:$0xff]  }
 0xab7   :  { %v1710_v7 = vpack.c.bf16 %v1696_v52, %v1694_v53  ;;  %v1693_v38 = vmax.f32 %v1655_v49, 0.0  ;;  %v3709_v13 = vld [vmem:[%s3880_s10 + $0xe4] ss:$8 sps:$4 sm:$0xff]   ;;  %v3727_v50 = vld [vmem:[%s3880_s10 + $0xd0] ss:$8 sps:$4 sm:$0xff]  }
 0xab8   :  { %1725 = vmatprep.subr.bf16.mxu0 %v1716_v47  ;;  %v1711_v15 = vpack.c.bf16 %v1699_v1, %v1697_v58  ;;  %v3679_v47 = vld [vmem:[%s3880_s10 + $0x10] ss:$8 sps:$4 sm:$0xff]   ;;  %v3739_v25 = vld [vmem:[%s3880_s10 + $0xc0] ss:$8 sps:$4 sm:$0xff]   ;;  %v3781_v58 = vld [vmem:[%s3880_s10 + $0x84] ss:$8 sps:$4 sm:$0xff]  }
 0xab9   :  { %1726 = vmatpush1.bf16.msra.mxu0 %v1715_v3  ;;  %v1709_v0 = vpack.c.bf16 %v1695_v14, %v1693_v38  ;;  %v3697_v3 = vld [vmem:[%s3880_s10 + $0xf4] ss:$8 sps:$4 sm:$0xff]   ;;  %v3751_v1 = vld [vmem:[%s3880_s10 + $0xb0] ss:$8 sps:$4 sm:$0xff]   ;;  %v3763_v52 = vld [vmem:[%s3880_s10 + $0xa0] ss:$8 sps:$4 sm:$0xff]  }
 0xaba   :  { %1727 = vmatprep.subr.bf16.mxu0 %v1714_v10  ;;  %v3715_v10 = vld [vmem:[%s3880_s10 + $0xe0] ss:$8 sps:$4 sm:$0xff]   ;;  %v3775_v49 = vld [vmem:[%s3880_s10 + $0x90] ss:$8 sps:$4 sm:$0xff]  }
 0xabb   :  { %v3787_v53 = vld [vmem:[%s3880_s10 + $0x80] ss:$8 sps:$4 sm:$0xff]  }
 0xabd   :  { %1728 = vmatpush1.bf16.msra.mxu0 %v1713_v5  ;;  %v3757_v5 = vld [vmem:[%s3880_s10 + $0xa4] ss:$8 sps:$4 sm:$0xff]  }
 0xabe   :  { %1729 = vmatprep.subr.bf16.mxu0 %v1712_v55  ;;  %v3769_v55 = vld [vmem:[%s3880_s10 + $0x94] ss:$8 sps:$4 sm:$0xff]  }
 0xac1   :  { %1730 = vmatpush1.bf16.msra.mxu0 %v1711_v15  ;;  %v2388_v15 = vld [vmem:[%s3881_s11 + $0x84] ss:$8 sps:$4 sm:$0xff]  }
 0xac2   :  { %1731 = vmatprep.subr.bf16.mxu0 %v1710_v7  ;;  %v2389_v7 = vld [vmem:[%s3881_s11 + $0x80] ss:$8 sps:$4 sm:$0xff]  }
 0xac5   :  { %1732 = vmatpush1.bf16.msra.mxu0 %v1709_v0 }
 0xac8   :  { %2215 = vmatmul.mubr.msk.bf16.vlgmr.msra.gmra.mxu0 %vm412_vm4, %v4104_v22 }
 0xac9   :  { %1834 = vmatprep.mubr.f32.mxu0 %v4077_v18 }
 0xb88   :  { %v1751_v31 = vpop.f32.mrf.mxu0 }
 0xb89   :  { %v1752_v12 = vadd.f32 %v1751_v31, %v4105_v56 }
 0xb8a   :  { %v1753_v40 = vpop.f32.mrf.mxu0 }
 0xb8b   :  { %v1754_v4 = vadd.f32 %v1753_v40, %v4105_v56  ;;  %v3581_v57 = vadd.f32 %v1752_v12, %v3376_v45  ;;  %v3594_v56 = vld [vmem:[%s3882_s9] sm:$0xf]  ;;  %v3601_v45 = vld [vmem:[%s3880_s10 + $0x74] ss:$8 sps:$4 sm:$0xff]  }
 0xb8c   :  { %v1755_v39 = vpop.f32.mrf.mxu0 }
 0xb8d   :  { %v1759_v33 = vadd.f32 %v1754_v4, %v3380_v26  ;;  %v3607_v26 = vld [vmem:[%s3880_s10 + $0x70] ss:$8 sps:$4 sm:$0xff]   ;;  %v1841_v14 = vpack.c.bf16 %v3581_v57, %v3581_v57 }
 0xb8e   :  { %v1756_v9 = vpop.f32.mrf.mxu0 }
 0xb8f   :  { %v1762_v8 = vcombine.low %v3581_v57, %v1759_v33  ;;  %2217 = vmatprep.subr.msk.mxu0 %vm204_vm0, %v1759_v33  ;;  %v1842_v22 = vpack.c.bf16 %v1759_v33, %v1759_v33 }
 0xb90   :  { %2218 = vmatpush1.msk.msra.mxu0 %vm204_vm0, %v3581_v57 }
 0xb91   :  { %2216 = vst [vmem:[%s3883_s13 + $0x20] sm:$0xff] %v1762_v8  ;;  %2219 = vmatmul.mubr.msk.f32.vlgmr.msra.gmra.mxu0 %vm290_vm3, %v3594_v56  ;;  %1886 = vmatprep.subr.bf16.mxu0 %v3601_v45 }
 0xb92   :  { %1887 = vmatpush1.bf16.msra.mxu0 %v3607_v26  ;;  %1918 = vmatprep.mubr.bf16.mxu0 %v1842_v22 }
 0xb93   :  { %1888 = vmatprep.subr.bf16.mxu0 %v3613_v35 }
 0xb96   :  { %1889 = vmatpush1.bf16.msra.mxu0 %v3619_v46 }
 0xb97   :  { %1890 = vmatprep.subr.bf16.mxu0 %v3625_v2 }
 0xb9a   :  { %1891 = vmatpush1.bf16.msra.mxu0 %v3631_v29 }
 0xb9b   :  { %1892 = vmatprep.subr.bf16.mxu0 %v3637_v30 }
 0xb9e   :  { %1893 = vmatpush1.bf16.msra.mxu0 %v3643_v61 }
 0xb9f   :  { %1894 = vmatprep.subr.bf16.mxu0 %v3649_v43 }
 0xba2   :  { %1895 = vmatpush1.bf16.msra.mxu0 %v3655_v28 }
 0xba3   :  { %1896 = vmatprep.subr.bf16.mxu0 %v3661_v32 }
 0xba6   :  { %1897 = vmatpush1.bf16.msra.mxu0 %v3667_v27 }
 0xba7   :  { %1898 = vmatprep.subr.bf16.mxu0 %v3673_v59 }
 0xbaa   :  { %1899 = vmatpush1.bf16.msra.mxu0 %v3679_v47 }
 0xbab   :  { %1900 = vmatprep.subr.bf16.mxu0 %v3685_v36 }
 0xbae   :  { %1901 = vmatpush1.bf16.msra.mxu0 %v3691_v54 }
 0xbaf   :  { %1902 = vmatprep.subr.bf16.mxu0 %v3697_v3 }
 0xbb2   :  { %1903 = vmatpush2.bf16.msra.mxu0 %v3703_v51 }
 0xbb3   :  { %1904 = vmatprep.subr.bf16.mxu0 %v3709_v13 }
 0xbb6   :  { %1905 = vmatpush2.bf16.msra.mxu0 %v3715_v10 }
 0xbb7   :  { %1906 = vmatprep.subr.bf16.mxu0 %v3721_v11 }
 0xbba   :  { %1907 = vmatpush2.bf16.msra.mxu0 %v3727_v50 }
 0xbbb   :  { %1908 = vmatprep.subr.bf16.mxu0 %v3733_v48 }
 0xbbe   :  { %1909 = vmatpush2.bf16.msra.mxu0 %v3739_v25 }
 0xbbf   :  { %1910 = vmatprep.subr.bf16.mxu0 %v3745_v20 }
 0xbc2   :  { %1911 = vmatpush2.bf16.msra.mxu0 %v3751_v1 }
 0xbc3   :  { %1912 = vmatprep.subr.bf16.mxu0 %v3757_v5 }
 0xbc6   :  { %1913 = vmatpush2.bf16.msra.mxu0 %v3763_v52 }
 0xbc7   :  { %1914 = vmatprep.subr.bf16.mxu0 %v3769_v55 }
 0xbca   :  { %1915 = vmatpush2.bf16.msra.mxu0 %v3775_v49 }
 0xbcb   :  { %1916 = vmatprep.subr.bf16.mxu0 %v3781_v58 }
 0xbce   :  { %1917 = vmatpush2.bf16.msra.mxu0 %v3787_v53 }
 0xbcf   :  { %2058 = vmatprep.subr.bf16.mxu0 %v3325_v21  ;;  %v4171_v21 = vld [vmem:[#allocation12_spill] sm:$0xff] }
 0xbd1   :  { %1919 = vmatmul.mubr.bf16.vlgmr.msra.gmra.mxu0 %v1841_v14 }
 0xbd2   :  { %2059 = vmatpush1.bf16.msra.mxu0 %v3331_v17  ;;  %v4172_v17 = vld [vmem:[#allocation11_spill] sm:$0xff] }
 0xbd3   :  { %2060 = vmatprep.subr.bf16.mxu0 %v3338_v44  ;;  %v4173_v44 = vld [vmem:[#allocation14_spill] sm:$0xff] }
 0xbd6   :  { %2061 = vmatpush1.bf16.msra.mxu0 %v3344_v41  ;;  %v4174_v41 = vld [vmem:[#allocation15_spill] sm:$0xff] }
 0xbd7   :  { %2062 = vmatprep.subr.bf16.mxu0 %v3396_v6  ;;  %v4175_v6 = vld [vmem:[#allocation17_spill] sm:$0xff] }
 0xbda   :  { %2063 = vmatpush1.bf16.msra.mxu0 %v3405_v42  ;;  %v4176_v42 = vld [vmem:[#allocation16_spill] sm:$0xff] }
 0xbdb   :  { %2064 = vmatprep.subr.bf16.mxu0 %v3411_v24  ;;  %v4177_v24 = vld [vmem:[#allocation18_spill] sm:$0xff] }
 0xbde   :  { %2065 = vmatpush1.bf16.msra.mxu0 %v3417_v37  ;;  %v4178_v37 = vld [vmem:[#allocation19_spill] sm:$0xff] }
 0xbdf   :  { %2066 = vmatprep.subr.bf16.mxu0 %v3423_v34  ;;  %v4179_v34 = vld [vmem:[#allocation20_spill] sm:$0xff] }
 0xbe2   :  { %2067 = vmatpush1.bf16.msra.mxu0 %v3432_v23  ;;  %v4180_v23 = vld [vmem:[#allocation21_spill] sm:$0xff] }
 0xbe3   :  { %2068 = vmatprep.subr.bf16.mxu0 %v3438_v19  ;;  %v4181_v19 = vld [vmem:[#allocation22_spill] sm:$0xff] }
 0xbe6   :  { %2069 = vmatpush1.bf16.msra.mxu0 %v3444_v62  ;;  %v4182_v62 = vld [vmem:[#allocation41_spill] sm:$0xff] }
 0xbe7   :  { %2070 = vmatprep.subr.bf16.mxu0 %v3450_v16  ;;  %v4183_v16 = vld [vmem:[#allocation43_spill] sm:$0xff] }
 0xbea   :  { %2071 = vmatpush1.bf16.msra.mxu0 %v3458_v60  ;;  %v4184_v60 = vld [vmem:[#allocation44_spill] sm:$0xff] }
 0xbeb   :  { %2072 = vmatprep.subr.bf16.mxu0 %v3464_v63  ;;  %v4185_v63 = vld [vmem:[#allocation45_spill] sm:$0xff] }
 0xbee   :  { %2073 = vmatpush1.bf16.msra.mxu0 %v4171_v21 }
 0xbef   :  { %2074 = vmatprep.subr.bf16.mxu0 %v4172_v17 }
 0xbf2   :  { %2075 = vmatpush2.bf16.msra.mxu0 %v4173_v44  ;;  %v4186_v44 = vld [vmem:[#allocation62_spill] sm:$0xff] }
 0xbf3   :  { %2076 = vmatprep.subr.bf16.mxu0 %v4174_v41 }
 0xbf6   :  { %2077 = vmatpush2.bf16.msra.mxu0 %v4175_v6  ;;  %v4187_v6 = vld [vmem:[#allocation63_spill] sm:$0xff] }
 0xbf7   :  { %2078 = vmatprep.subr.bf16.mxu0 %v4176_v42 }
 0xbfa   :  { %2079 = vmatpush2.bf16.msra.mxu0 %v4177_v24 }
 0xbfb   :  { %2080 = vmatprep.subr.bf16.mxu0 %v4178_v37 }
 0xbfe   :  { %2081 = vmatpush2.bf16.msra.mxu0 %v4179_v34 }
 0xbff   :  { %2082 = vmatprep.subr.bf16.mxu0 %v4180_v23 }
 0xc02   :  { %2083 = vmatpush2.bf16.msra.mxu0 %v4181_v19 }
 0xc03   :  { %2084 = vmatprep.subr.bf16.mxu0 %v4182_v62 }
 0xc06   :  { %2085 = vmatpush2.bf16.msra.mxu0 %v4183_v16 }
 0xc07   :  { %2086 = vmatprep.subr.bf16.mxu0 %v4184_v60 }
 0xc0a   :  { %2087 = vmatpush2.bf16.msra.mxu0 %v4185_v63 }
 0xc0b   :  { %2088 = vmatprep.subr.bf16.mxu0 %v2388_v15 }
 0xc0e   :  { %2089 = vmatpush2.bf16.msra.mxu0 %v2389_v7 }
 0xc51   :  { %v1836_v38 = vpop.f32.mrf.mxu0 }
 0xc52   :  { %v1843_v12 = vpack.c.bf16 %v1836_v38, %v1836_v38 }
 0xc53   :  { %v1838_v0 = vpop.f32.mrf.mxu0 }
 0xc54   :  { %v1844_v31 = vpack.c.bf16 %v1838_v0, %v1838_v0 }
 0xc56   :  { %1877 = vmatprep.mubr.bf16.mxu1 %v1844_v31 }
 0xc57   :  { %1878 = vmatmul.mubr.bf16.vlgmr.msra.gmra.mxu1 %v1843_v12 }
 0xc58   :  { %2005 = vmatprep.mubr.f32.mxu1 %v4077_v18 }
 0xc91   :  { %v1920_v40 = vpop.f32.mrf.mxu0 }
 0xc93   :  { %v1922_v4 = vpop.f32.mrf.mxu0 }
 0xc95   :  { %v1924_v39 = vpop.f32.mrf.mxu0 }
 0xc97   :  { %v1925_v57 = vpop.f32.mrf.mxu0 }
 0xd17   :  { %v1879_v33 = vpop.f32.mrf.mxu1 }
 0xd18   :  { %v1921_v8 = vadd.f32 %v1920_v40, %v1879_v33 }
 0xd19   :  { %v1881_v9 = vpop.f32.mrf.mxu1 }
 0xd1a   :  { %v1923_v22 = vadd.f32 %v1922_v4, %v1881_v9 }
 0xd1b   :  { %v1883_v14 = vpop.f32.mrf.mxu1 }
 0xd1c   :  { %v1929_v21 = vcombine.low %v1921_v8, %v1923_v22 }
 0xd1d   :  { %v1884_v17 = vpop.f32.mrf.mxu1 }
 0xd1e   :  { %v1931_v41 = vmul.f32 %v1929_v21, %v4186_v44 }
 0xd20   :  { %v1932_v42 = vadd.f32 %v1931_v41, %v4187_v6 }
 0xd22   :  { %2220 = vst [vmem:[%s3883_s13 + $0x28] sm:$0xff] %v1932_v42  ;;  %v1936_v18 = vcombine.high %v1932_v42, %v1932_v42 }
 0xd24   :  { %2221 = vmatprep.subr.msk.mxu1 %vm204_vm0, %v1936_v18  ;;  %v2014_v24 = vpack.c.bf16 %v1936_v18, %v1936_v18 }
 0xd25   :  { %2222 = vmatpush1.msk.msra.mxu1 %vm204_vm0, %v1932_v42 }
 0xd26   :  { %2223 = vmatmul.mubr.msk.f32.vlgmr.msra.gmra.mxu1 %vm290_vm3, %v3594_v56  ;;  %2015 = vmatprep.subr.bf16.mxu1 %v3601_v45  ;;  %v2013_v56 = vpack.c.bf16 %v1932_v42, %v1932_v42 }
 0xd27   :  { %2016 = vmatpush1.bf16.msra.mxu1 %v3607_v26  ;;  %2047 = vmatprep.mubr.bf16.mxu1 %v2014_v24 }
 0xd28   :  { %2017 = vmatprep.subr.bf16.mxu1 %v3613_v35 }
 0xd2b   :  { %2018 = vmatpush1.bf16.msra.mxu1 %v3619_v46 }
 0xd2c   :  { %2019 = vmatprep.subr.bf16.mxu1 %v3625_v2 }
 0xd2f   :  { %2020 = vmatpush1.bf16.msra.mxu1 %v3631_v29 }
 0xd30   :  { %2021 = vmatprep.subr.bf16.mxu1 %v3637_v30 }
 0xd33   :  { %2022 = vmatpush1.bf16.msra.mxu1 %v3643_v61 }
 0xd34   :  { %2023 = vmatprep.subr.bf16.mxu1 %v3649_v43 }
 0xd37   :  { %2024 = vmatpush1.bf16.msra.mxu1 %v3655_v28 }
 0xd38   :  { %2025 = vmatprep.subr.bf16.mxu1 %v3661_v32 }
 0xd3b   :  { %2026 = vmatpush1.bf16.msra.mxu1 %v3667_v27 }
 0xd3c   :  { %2027 = vmatprep.subr.bf16.mxu1 %v3673_v59 }
 0xd3f   :  { %2028 = vmatpush1.bf16.msra.mxu1 %v3679_v47 }
 0xd40   :  { %2029 = vmatprep.subr.bf16.mxu1 %v3685_v36 }
 0xd43   :  { %2030 = vmatpush1.bf16.msra.mxu1 %v3691_v54 }
 0xd44   :  { %2031 = vmatprep.subr.bf16.mxu1 %v3697_v3 }
 0xd47   :  { %2032 = vmatpush2.bf16.msra.mxu1 %v3703_v51 }
 0xd48   :  { %2033 = vmatprep.subr.bf16.mxu1 %v3709_v13 }
 0xd4b   :  { %2034 = vmatpush2.bf16.msra.mxu1 %v3715_v10 }
 0xd4c   :  { %2035 = vmatprep.subr.bf16.mxu1 %v3721_v11 }
 0xd4f   :  { %2036 = vmatpush2.bf16.msra.mxu1 %v3727_v50 }
 0xd50   :  { %2037 = vmatprep.subr.bf16.mxu1 %v3733_v48 }
 0xd53   :  { %2038 = vmatpush2.bf16.msra.mxu1 %v3739_v25 }
 0xd54   :  { %2039 = vmatprep.subr.bf16.mxu1 %v3745_v20 }
 0xd57   :  { %2040 = vmatpush2.bf16.msra.mxu1 %v3751_v1 }
 0xd58   :  { %2041 = vmatprep.subr.bf16.mxu1 %v3757_v5 }
 0xd5b   :  { %2042 = vmatpush2.bf16.msra.mxu1 %v3763_v52 }
 0xd5c   :  { %2043 = vmatprep.subr.bf16.mxu1 %v3769_v55 }
 0xd5f   :  { %2044 = vmatpush2.bf16.msra.mxu1 %v3775_v49 }
 0xd60   :  { %2045 = vmatprep.subr.bf16.mxu1 %v3781_v58 }
 0xd63   :  { %2046 = vmatpush2.bf16.msra.mxu1 %v3787_v53 }
 0xd66   :  { %2048 = vmatmul.mubr.bf16.vlgmr.msra.gmra.mxu1 %v2013_v56 }
 0xde6   :  { %v2007_v45 = vpop.f32.mrf.mxu1 }
 0xde7   :  { %v2056_v46 = vpack.c.bf16 %v2007_v45, %v2007_v45 }
 0xde8   :  { %v2009_v26 = vpop.f32.mrf.mxu1 }
 0xde9   :  { %v2057_v35 = vpack.c.bf16 %v2009_v26, %v2009_v26 }
 0xdeb   :  { %2090 = vmatprep.mubr.bf16.mxu0 %v2057_v35 }
 0xdec   :  { %2091 = vmatmul.mubr.bf16.vlgmr.msra.gmra.mxu0 %v2056_v46 }
 0xe26   :  { %v2049_v2 = vpop.f32.mrf.mxu1 }
 0xe28   :  { %v2051_v29 = vpop.f32.mrf.mxu1 }
 0xe2a   :  { %v2053_v30 = vpop.f32.mrf.mxu1 }
 0xe2c   :  { %v2054_v61 = vpop.f32.mrf.mxu1 }
 0xeac   :  { %v2092_v43 = vpop.f32.mrf.mxu0 }
 0xead   :  { %v2099_v32 = vsub.f32 %v2049_v2, %v2092_v43 }
 0xeae   :  { %v2094_v28 = vpop.f32.mrf.mxu0 }
 0xeaf   :  { %v2100_v27 = vsub.f32 %v2051_v29, %v2094_v28 }
 0xeb0   :  { %v2096_v59 = vpop.f32.mrf.mxu0 }
 0xeb1   :  { %v2103_v47 = vcombine.low %v2099_v32, %v2100_v27 }
 0xeb2   :  { %v2097_v36 = vpop.f32.mrf.mxu0 }
 0xeb3   :  { %2105 = vst [vmem:[%s3886_s12] sm:$0xff] %v2103_v47 }

</bundles_post_ra>
